<compile_context>
chip_gen: v7x
topology: tpu7x:2x2x1
jax: 0.10.0
libtpu: 0.0.40
codegen_flags: <defaults>
</compile_context>

<pallas_src>
import functools

import jax
import jax.numpy as jnp
from jax.experimental import pallas as pl
from jax.experimental.pallas import tpu as pltpu


def _round_up(x, m):
    return ((x + m - 1) // m) * m


@functools.lru_cache(maxsize=None)
def _vmem_capacity_bytes():
    # Trace-time hardware query; conservative (v7x-sized) fallback if the
    # query is unavailable (e.g. interpret mode).
    try:
        return int(pltpu.get_tpu_info().vmem_capacity_bytes)
    except Exception:
        return 64 * 2 ** 20


def _vmem_need_bytes(tm, tn, d, x_bytes, o_bytes):
    """VMEM footprint with the actual per-operand buffer counts."""
    resident = tn == d
    w1 = d * d * 2                               # bf16, Buffered(1)
    w2 = d * tn * 2 * (1 if resident else 2)     # bf16; streamed -> 2 buffers
    b1 = d * 4                                   # f32, Buffered(1)
    b2 = tn * 4 * (1 if resident else 2)
    x = 2 * tm * d * x_bytes                     # double-buffered input tile
    o = 2 * tm * tn * o_bytes                    # double-buffered output tile
    h = tm * d * 2                               # bf16 scratch (single buffer)
    return w1 + w2 + b1 + b2 + x + o + h


def _select_tiles(batch, d, x_bytes, o_bytes, block_m, budget):
    tm = min(block_m, batch)
    if tm != batch and tm % 8 != 0:
        tm = _round_up(tm, 8)
    tn = d
    # Largest batch tile (halving) that fits with both weights resident.
    while tm > 8 and _vmem_need_bytes(tm, tn, d, x_bytes, o_bytes) > budget:
        tm = max(8, _round_up(tm // 2, 8))
    # Large-D fallback (v7x 64 MiB VMEM): stream w2 in (d, tn) column tiles.
    while (_vmem_need_bytes(tm, tn, d, x_bytes, o_bytes) > budget
           and tn % 256 == 0):
        tn //= 2
    return tm, tn


def _residual_block_kernel(x_ref, w1_ref, b1_ref, w2_ref, b2_ref, o_ref,
                           h_ref, *, tn, d):
    j = pl.program_id(1)

    # First linear + LeakyReLU, computed once per batch tile and stashed in a
    # bf16 VMEM scratch (reused across the tn column tiles of the 2nd linear).
    @pl.when(j == 0)
    def _():
        x = x_ref[...].astype(jnp.float32)
        h = jnp.dot(x.astype(jnp.bfloat16), w1_ref[...],
                    preferred_element_type=jnp.float32) + b1_ref[...]
        h = jnp.maximum(h, 0.01 * h)        # LeakyReLU(negative_slope=0.01)
        # Dropout(0.5): identity in eval mode (see TODO at top).
        h_ref[...] = h.astype(jnp.bfloat16)

    # Second linear on the current output-column tile (bf16 MXU, f32 acc).
    r = jnp.dot(h_ref[...], w2_ref[...],
                preferred_element_type=jnp.float32) + b2_ref[...]
    # Dropout(0.5): identity in eval mode.

    # Residual add with the matching slice of the original input, in f32.
    if tn == d:
        x_res = x_ref[...]
    else:
        col = pl.multiple_of(j * tn, 128)
        x_res = x_ref[:, pl.ds(col, tn)]
    o_ref[...] = (r + x_res.astype(jnp.float32)).astype(o_ref.dtype)


@functools.partial(jax.jit, static_argnames=("block_m",))
def residual_block(x, w1, b1, w2, b2, block_m=512):
    """ResidualBlock forward (eval mode).

    x:  (B, D) f32 or bf16 activations.
    w1, w2: (D, D) bf16, pre-transposed to (in, out) layout.
    b1, b2: (D,) or (1, D) f32.
    Returns (B, D) in x.dtype.
    """
    batch, d = x.shape
    b1 = b1.reshape(1, d).astype(jnp.float32)
    b2 = b2.reshape(1, d).astype(jnp.float32)

    cap = _vmem_capacity_bytes()
    tm, tn = _select_tiles(batch, d, x.dtype.itemsize, x.dtype.itemsize,
                           block_m, budget=int(0.75 * cap))
    grid_i = pl.cdiv(batch, tm)
    grid_j = d // tn
    resident = tn == d

    # Megacore: only split the batch axis when each core gets >= 2 steps.
    batch_sem = "parallel" if grid_i >= 4 else "arbitrary"

    def _const_spec(shape):
        # Constant-index operand -> single buffer (no pointless double-buffer).
        return pl.BlockSpec(shape, lambda i, j: (0, 0),
                            pipeline_mode=pl.Buffered(1))

    x_spec = pl.BlockSpec((tm, d), lambda i, j: (i, 0))
    if resident:
        w2_spec = _const_spec((d, tn))
        b2_spec = _const_spec((1, tn))
    else:
        w2_spec = pl.BlockSpec((d, tn), lambda i, j: (0, j))
        b2_spec = pl.BlockSpec((1, tn), lambda i, j: (0, j))

    kernel = functools.partial(_residual_block_kernel, tn=tn, d=d)

    return pl.pallas_call(
        kernel,
        out_shape=jax.ShapeDtypeStruct((batch, d), x.dtype),
        grid=(grid_i, grid_j),
        in_specs=[
            x_spec,
            _const_spec((d, d)),      # w1 (resident)
            _const_spec((1, d)),      # b1 (resident)
            w2_spec,
            b2_spec,
        ],
        out_specs=pl.BlockSpec((tm, tn), lambda i, j: (i, j)),
        scratch_shapes=[pltpu.VMEM((tm, d), jnp.bfloat16)],
        compiler_params=pltpu.CompilerParams(
            dimension_semantics=(batch_sem, "arbitrary"),
            vmem_limit_bytes=int(0.85 * cap),
        ),
    )(x, w1, b1, w2, b2)


if __name__ == "__main__":
    key = jax.random.PRNGKey(0)
    kx, k1, k2, k3, k4 = jax.random.split(key, 5)

    # Lane-dense feature width (multiple of 128); output_dim == input_dim so
    # the module's residual `layers(x) + x` is well-defined.
    input_dim = output_dim = 128
    batch = 1024                      # TM=512 -> 2 batch grid steps

    # PyTorch Linear weights are (out, in); store pre-transposed (in, out),
    # rounded to bf16 once on the host for the MXU.
    w1 = (jax.random.normal(k1, (input_dim, output_dim), jnp.float32)
          * 0.02).astype(jnp.bfloat16)
    w2 = (jax.random.normal(k2, (output_dim, output_dim), jnp.float32)
          * 0.02).astype(jnp.bfloat16)
    b1 = jax.random.normal(k3, (1, output_dim), jnp.float32) * 0.01
    b2 = jax.random.normal(k4, (1, output_dim), jnp.float32) * 0.01

    x = jax.random.normal(kx, (batch, input_dim), jnp.float32)

    out = jax.block_until_ready(residual_block(x, w1, b1, w2, b2))

    # Pure-JAX f32 reference (weights already bf16-rounded on host, so only
    # the activation-side bf16 casts contribute to the tolerance).
    def _reference(xv):
        h = xv @ w1.astype(jnp.float32) + b1
        h = jnp.where(h >= 0, h, 0.01 * h)
        r = h @ w2.astype(jnp.float32) + b2
        return r + xv

    expected = _reference(x)
    assert out.shape == (batch, input_dim)
    err = float(jnp.max(jnp.abs(out - expected)))
    assert jnp.allclose(out, expected, atol=1e-2, rtol=1e-2), err

    print("KERNEL_OK")
</pallas_src>

<mosaic_0001>
module attributes {stable_mosaic.version = 11 : i64} {
  func.func @_residual_block_kernel(%arg0: i32, %arg1: i32, %arg2: memref<512x128xf32, #tpu.memory_space<vmem>>, %arg3: memref<128x128xbf16, #tpu.memory_space<vmem>>, %arg4: memref<1x128xf32, #tpu.memory_space<vmem>>, %arg5: memref<128x128xbf16, #tpu.memory_space<vmem>>, %arg6: memref<1x128xf32, #tpu.memory_space<vmem>>, %arg7: memref<512x128xf32, #tpu.memory_space<vmem>>, %arg8: memref<512x128xbf16, #tpu.memory_space<vmem>>) attributes {dimension_semantics = [#tpu.dimension_semantics<arbitrary>, #tpu.dimension_semantics<arbitrary>], iteration_bounds = array<i64: 2, 1>, scalar_prefetch = 0 : i64, scratch_operands = 1 : i64, tpu.core_type = #tpu.core_type<tc>, window_params = [{transform_indices = @transform_0, window_bounds = array<i64: 512, 128>}, {pipeline_mode = #tpu.pipeline_mode<synchronous>, transform_indices = @transform_1, window_bounds = array<i64: 128, 128>}, {pipeline_mode = #tpu.pipeline_mode<synchronous>, transform_indices = @transform_2, window_bounds = array<i64: 1, 128>}, {pipeline_mode = #tpu.pipeline_mode<synchronous>, transform_indices = @transform_3, window_bounds = array<i64: 128, 128>}, {pipeline_mode = #tpu.pipeline_mode<synchronous>, transform_indices = @transform_4, window_bounds = array<i64: 1, 128>}, {transform_indices = @transform_5, window_bounds = array<i64: 512, 128>}]} {
    %c0_i32 = arith.constant 0 : i32
    %0 = arith.cmpi eq, %arg1, %c0_i32 : i32
    %1 = arith.extui %0 : i1 to i32
    %c0_i32_0 = arith.constant 0 : i32
    %2 = arith.cmpi ne, %1, %c0_i32_0 : i32
    scf.if %2 {
      %c0_10 = arith.constant 0 : index
      %c0_11 = arith.constant 0 : index
      %12 = vector.load %arg2[%c0_10, %c0_11] : memref<512x128xf32, #tpu.memory_space<vmem>>, vector<512x128xf32>
      %13 = arith.truncf %12 : vector<512x128xf32> to vector<512x128xbf16>
      %c0_12 = arith.constant 0 : index
      %c0_13 = arith.constant 0 : index
      %14 = vector.load %arg3[%c0_12, %c0_13] : memref<128x128xbf16, #tpu.memory_space<vmem>>, vector<128x128xbf16>
      %cst_14 = arith.constant dense<0.000000e+00> : vector<512x128xf32>
      %15 = tpu.matmul %13, %14, %cst_14 {dimension_numbers = #tpu.dot_dimension_numbers<[1], [0], [0], [1], [0, 0, 1, 1], [], []>} : vector<512x128xbf16>, vector<128x128xbf16>, vector<512x128xf32> -> vector<512x128xf32>
      %c0_15 = arith.constant 0 : index
      %c0_16 = arith.constant 0 : index
      %16 = vector.load %arg4[%c0_15, %c0_16] : memref<1x128xf32, #tpu.memory_space<vmem>>, vector<1x128xf32>
      %17 = vector.broadcast %16 : vector<1x128xf32> to vector<512x128xf32>
      %18 = arith.addf %15, %17 : vector<512x128xf32>
      %cst_17 = arith.constant 0.00999999977 : f32
      %19 = vector.broadcast %cst_17 : f32 to vector<512x128xf32>
      %20 = arith.mulf %19, %18 : vector<512x128xf32>
      %21 = arith.maximumf %18, %20 : vector<512x128xf32>
      %22 = arith.truncf %21 : vector<512x128xf32> to vector<512x128xbf16>
      %c0_18 = arith.constant 0 : index
      %c0_19 = arith.constant 0 : index
      %23 = vector.load %arg8[%c0_18, %c0_19] : memref<512x128xbf16, #tpu.memory_space<vmem>>, vector<512x128xbf16>
      tpu.vector_store %arg8[%c0_18, %c0_19], %22 {strides = array<i32>} : memref<512x128xbf16, #tpu.memory_space<vmem>>, vector<512x128xbf16>,
    } else {
    }
    %c0 = arith.constant 0 : index
    %c0_1 = arith.constant 0 : index
    %3 = vector.load %arg8[%c0, %c0_1] : memref<512x128xbf16, #tpu.memory_space<vmem>>, vector<512x128xbf16>
    %c0_2 = arith.constant 0 : index
    %c0_3 = arith.constant 0 : index
    %4 = vector.load %arg5[%c0_2, %c0_3] : memref<128x128xbf16, #tpu.memory_space<vmem>>, vector<128x128xbf16>
    %cst = arith.constant dense<0.000000e+00> : vector<512x128xf32>
    %5 = tpu.matmul %3, %4, %cst {dimension_numbers = #tpu.dot_dimension_numbers<[1], [0], [0], [1], [0, 0, 1, 1], [], []>} : vector<512x128xbf16>, vector<128x128xbf16>, vector<512x128xf32> -> vector<512x128xf32>
    %c0_4 = arith.constant 0 : index
    %c0_5 = arith.constant 0 : index
    %6 = vector.load %arg6[%c0_4, %c0_5] : memref<1x128xf32, #tpu.memory_space<vmem>>, vector<1x128xf32>
    %7 = vector.broadcast %6 : vector<1x128xf32> to vector<512x128xf32>
    %8 = arith.addf %5, %7 : vector<512x128xf32>
    %c0_6 = arith.constant 0 : index
    %c0_7 = arith.constant 0 : index
    %9 = vector.load %arg2[%c0_6, %c0_7] : memref<512x128xf32, #tpu.memory_space<vmem>>, vector<512x128xf32>
    %10 = arith.addf %8, %9 : vector<512x128xf32>
    %c0_8 = arith.constant 0 : index
    %c0_9 = arith.constant 0 : index
    %11 = vector.load %arg7[%c0_8, %c0_9] : memref<512x128xf32, #tpu.memory_space<vmem>>, vector<512x128xf32>
    tpu.vector_store %arg7[%c0_8, %c0_9], %10 {strides = array<i32>} : memref<512x128xf32, #tpu.memory_space<vmem>>, vector<512x128xf32>,
    return
  }
  func.func @transform_0(%arg0: i32, %arg1: i32) -> (i32, i32) {
    %c0_i32 = arith.constant 0 : i32
    %c0_i32_0 = arith.constant 0 : i32
    return %arg0, %c0_i32 : i32, i32
  }
  func.func @transform_1(%arg0: i32, %arg1: i32) -> (i32, i32) {
    %c0_i32 = arith.constant 0 : i32
    %c0_i32_0 = arith.constant 0 : i32
    %c0_i32_1 = arith.constant 0 : i32
    return %c0_i32, %c0_i32_0 : i32, i32
  }
  func.func @transform_2(%arg0: i32, %arg1: i32) -> (i32, i32) {
    %c0_i32 = arith.constant 0 : i32
    %c0_i32_0 = arith.constant 0 : i32
    %c0_i32_1 = arith.constant 0 : i32
    return %c0_i32, %c0_i32_0 : i32, i32
  }
  func.func @transform_3(%arg0: i32, %arg1: i32) -> (i32, i32) {
    %c0_i32 = arith.constant 0 : i32
    %c0_i32_0 = arith.constant 0 : i32
    %c0_i32_1 = arith.constant 0 : i32
    return %c0_i32, %c0_i32_0 : i32, i32
  }
  func.func @transform_4(%arg0: i32, %arg1: i32) -> (i32, i32) {
    %c0_i32 = arith.constant 0 : i32
    %c0_i32_0 = arith.constant 0 : i32
    %c0_i32_1 = arith.constant 0 : i32
    return %c0_i32, %c0_i32_0 : i32, i32
  }
  func.func @transform_5(%arg0: i32, %arg1: i32) -> (i32, i32) {
    %c0_i32 = arith.constant 0 : i32
    return %arg0, %arg1 : i32, i32
  }
}

</mosaic_0001>

<bundles_post_ra>
// kernel: residual_block.1
= control target key start
LH: loop header
LB: loop body
LE: loop exit
PB: predicated region body
PF: predicated region fallthrough
CT: control target
= control target key end

     0   :  { %10 = vsyncpa [#allocation4], 0  ;;  %s2851_s0 = inlined_call_operand.hbm [shape: f32[1024,128], index: 0, kind: input, shape index: {}]   ;;  %s2852_s1 = inlined_call_operand.hbm [shape: bf16[128,128], index: 1, kind: input, shape index: {}]   ;;  %s2853_s2 = inlined_call_operand.vmem [shape: f32[1,128], index: 2, kind: input, shape index: {}]   ;;  %s2854_s3 = inlined_call_operand.hbm [shape: bf16[128,128], index: 3, kind: input, shape index: {}]   ;;  %s2855_s4 = inlined_call_operand.vmem [shape: f32[1,128], index: 4, kind: input, shape index: {}]   ;;  %s2856_s5 = inlined_call_operand.hbm [shape: f32[1024,128], index: 5, kind: output, shape index: {}]  }
   0x1   :  { %12 = vsyncpa [#allocation4 + $0x1], 0 }
   0x2   :  { %13 = vsyncpa [#allocation7], 0 }
   0x3   :  { %14 = vsyncpa [#allocation5], 0 }
   0x4   :  { %16 = vsyncpa [#allocation5 + $0x1], 0  ;;  %s2242_s18 = smov 0   ;;  %s2244_s19 = smov 0  }
   0x5   :  { %s2246_s20 = smov 0   ;;  %s2248_s21 = smov 0  }
   0x6   :  { %s2250_s22 = smov 0   ;;  %s2252_s23 = smov 0  }
   0x7 LB: > { %s1642_s24 = sadd.s32 4294967295, %s2200_s23   ;;  %s1643_s25 = sadd.s32 4294967294, %s2200_s23   ;;  %s2200_s23 = sphi %s2252_s23, %s22_s23   ;;  %s2196_s22 = sphi %s2250_s22, %s2878_s22   ;;  %s2192_s21 = sphi %s2248_s21, %s2877_s21   ;;  %s2188_s20 = sphi %s2246_s20, %s2876_s20   ;;  %s2184_s19 = sphi %s2244_s19, %s2875_s19   ;;  %s2180_s18 = sphi %s2242_s18, %s2874_s18  }
   0x8   : > { %p54_p0 = scmp.ne.s32.totalorder %s2184_s19, %s2180_s18  ;;  %p2276_p1 = scmp.eq.s32.totalorder %s1642_s24, 0 }
   0x9   : > { %p2280_p2 = scmp.eq.s32.totalorder %s1642_s24, 1  ;;  %p170_p3 = scmp.eq.s32.totalorder %s1643_s25, 1 }
   0xa   : > { %s2861_s26 = scalar_select %p2276_p1, 1, 0 }
   0xb   : > { %p2286_p4 = por %p2276_p1, %p54_p0  ;;  %p1644_p5 = scmp.ge.s32.totalorder %s2200_s23, 1 }
   0xc   : > { %p2291_p6 = por %p170_p3, %p54_p0  ;;  %p177_p7 = scmp.lt.s32.totalorder %s2200_s23, 3 }
   0xd   : > { %s2863_s28 = scalar_select %p2286_p4, 1, 0 }
   0xe   : > { %s2864_s29 = scalar_select %p2291_p6, 1, 0 }
   0xf   : > { %p2296_p8 = pnand %p1644_p5, %p177_p7  ;;  %s2202_s6 = smov [#allocation6]  }
  0x10   : > { %s189_s7 = sshll.u32 %s2202_s6, 4  ;;  %s2203_s9 = smov [#allocation8]   ;;  %s2300_s7 = int_to_ptr.vmem [resolvable:$true] %s189_s7 }
  0x11   : > { %p1933_p9 = pneg %p2296_p8  ;;  %s205_s10 = sshll.u32 %s2203_s9, 4  ;;  %s2311_s10 = int_to_ptr.vmem [resolvable:$true] %s205_s10 }
  0x12   : > { %s2028_s13 = scalar_lea.hbm %s2852_s1, 1024 }
  0x13   : > { %p2307_p11 = pnand %p1933_p9, %p2276_p1  ;;  %p2029_p12 = scmp.ne.s32.totalorder %s2852_s1, %s2028_s13 }
  0x14   : > { %p2035_p5 = scmp.lt.u32.totalorder %s2028_s13, %s2852_s1 }
  0x15   : > { %p2030_p13 = pneg %p2307_p11 }
  0x17   : > { %p2031_p0 = pnand %p2030_p13, %p2029_p12 }
  0x19   : > { %p2032_p3 = pneg %p2031_p0 }
  0x1b   : > { %p2037_p7 = pnand %p2035_p5, %p2032_p3 }
  0x1d   : > { %2040 = shalt.err (!%p2037_p7)
}
  0x1e   : > { %s2041_s24 = scalar_lea.vmem %s2300_s7, 1024  ;;  %p2049_p1 = scmp.lt.s32.totalorder %s2300_s7, %s2300_s7 }
  0x1f   : > { %p2042_p9 = scmp.ne.s32.totalorder %s2300_s7, %s2041_s24  ;;  %p2050_p12 = scmp.lt.s32.totalorder %s2041_s24, %s2041_s24 }
  0x21   : > { %p2044_p10 = pnand %p2042_p9, %p2030_p13  ;;  %p2051_p0 = por %p2050_p12, %p2049_p1 }
  0x23   : > { %p2045_p6 = pneg %p2044_p10 }
  0x25   : > { %p2052_p4 = pnand %p2051_p0, %p2045_p6 }
  0x27   : > { %2055 = shalt.err (!%p2052_p4)
}
  0x28   : > { %s2204_s25 = smov 64   ;;  %s2205_s6 = smov 4  }
  0x29   : > { %1936 = dma.hbm_to_vmem [thread:$0]  (!%p2307_p11), %s2852_s1, 1024, %s2300_s7, [#allocation7], %s2204_s25, %s2204_s25, %s2205_s6  }
  0x2a   : > { %s2056_s14 = scalar_lea.hbm %s2854_s3, 1024 }
  0x2b   : > { %p2057_p1 = scmp.ne.s32.totalorder %s2854_s3, %s2056_s14  ;;  %p2063_p10 = scmp.lt.u32.totalorder %s2056_s14, %s2854_s3 }
  0x2d   : > { %p2059_p4 = pnand %p2057_p1, %p2030_p13 }
  0x2f   : > { %p2060_p6 = pneg %p2059_p4 }
  0x31   : > { %p2065_p3 = pnand %p2063_p10, %p2060_p6 }
  0x33   : > { %2068 = shalt.err (!%p2065_p3)
}
  0x34   : > { %s2069_s7 = scalar_lea.vmem %s2311_s10, 1024  ;;  %p2077_p12 = scmp.lt.s32.totalorder %s2311_s10, %s2311_s10 }
  0x35   : > { %p2070_p5 = scmp.ne.s32.totalorder %s2311_s10, %s2069_s7  ;;  %p2078_p0 = scmp.lt.s32.totalorder %s2069_s7, %s2069_s7 }
  0x37   : > { %p2072_p7 = pnand %p2070_p5, %p2030_p13  ;;  %p2079_p1 = por %p2078_p0, %p2077_p12 }
  0x39   : > { %p2073_p9 = pneg %p2072_p7 }
  0x3b   : > { %p2080_p4 = pnand %p2079_p1, %p2073_p9 }
  0x3d   : > { %2083 = shalt.err (!%p2080_p4)
}
  0x3e   : > { %1939 = dma.hbm_to_vmem [thread:$0]  (!%p2307_p11), %s2854_s3, 1024, %s2311_s10, [#allocation7], %s2204_s25, %s2204_s25, %s2205_s6  }
  0x3f   : > { %s34_s12 = sadd.s32 1, %s2196_s22  ;;  %s41_s13 = sadd.s32 1, %s2188_s20 }
  0x40   : > { %p36_p13 = scmp.ge.s32.totalorder %s34_s12, 2  ;;  %p48_p6 = scmp.ne.s32.totalorder %s2188_s20, %s2184_s19 }
  0x41   : > { %p49_p10 = scmp.eq.s32.totalorder %s2200_s23, 0  ;;  %p1950_p3 = scmp.lt.s32.totalorder %s2200_s23, 2 }
  0x42   : > { %s2880_s12 = smov (%p36_p13, %s34_s12), 0  ;;  %p2375_p7 = por %p2280_p2, %p48_p6 }
  0x43   : > { %p50_p5 = por %p49_p10, %p48_p6  ;;  %s38_s14 = ssub.s32 %s2196_s22, %s2880_s12 }
  0x44   : > { %s2867_s8 = scalar_select %p2375_p7, 1, 0 }
  0x45   : > { %s222_s15 = sand.u32 1, %s2188_s20   ;;  %p39_p9 = scmp.eq.s32.totalorder %s38_s14, 0 }
  0x46   : > { %s1648_s10 = sshll.u32 %s222_s15, 9  ;;  %s1679_s25 = sshll.u32 %s2196_s22, 13 }
  0x47   : > { %s2384_s6 = scalar_select %p39_p9, %s2188_s20, %s41_s13  }
  0x48   : > { %s2389_s24 = scalar_lea.hbm %s2851_s0, %s1679_s25  ;;  %s226_s27 = scalar_lea.vmem [#allocation3], %s1648_s10 }
  0x49   : > { %s233_s7 = sshll.u32 %s226_s27, 4  ;;  %p2393_p2 = pnand %p1950_p3, %p50_p5  ;;  %s2397_s7 = int_to_ptr.vmem [resolvable:$true] %s233_s7 }
  0x4a   : > { %s2399_s11 = scalar_lea.sflag [#allocation4], %s222_s15  ;;  %s2084_s13 = scalar_lea.hbm %s2389_s24, 8192 }
  0x4b   : > { %p2085_p11 = scmp.ne.s32.totalorder %s2389_s24, %s2084_s13  ;;  %p2086_p12 = pneg %p2393_p2 }
  0x4c   : > { %s2089_s25 = scalar_lea.hbm %s2851_s0, 16384  ;;  %p2090_p4 = scmp.lt.u32.totalorder %s2389_s24, %s2851_s0 }
  0x4d   : > { %p2087_p0 = pnand %p2086_p12, %p2085_p11  ;;  %p2091_p13 = scmp.lt.u32.totalorder %s2089_s25, %s2084_s13 }
  0x4e   : > { %p2093_p10 = scmp.lt.u32.totalorder %s2084_s13, %s2389_s24 }
  0x4f   : > { %p2088_p1 = pneg %p2087_p0  ;;  %p2092_p6 = por %p2091_p13, %p2090_p4 }
  0x51   : > { %p2094_p3 = por %p2093_p10, %p2092_p6 }
  0x53   : > { %p2095_p5 = pnand %p2094_p3, %p2088_p1 }
  0x55   : > { %2098 = shalt.err (!%p2095_p5)
}
  0x56   : > { %s2099_s15 = scalar_lea.vmem %s2397_s7, 8192  ;;  %s2206_s27 = smov [#allocation3]  }
  0x57   : > { %p2100_p9 = scmp.ne.s32.totalorder %s2397_s7, %s2099_s15  ;;  %s2104_s14 = sshll.u32 %s2206_s27, 4  ;;  %s2105_s14 = int_to_ptr.vmem [resolvable:$false] %s2104_s14 }
  0x58   : > { %s2106_s10 = scalar_lea.vmem %s2105_s14, 16384  ;;  %p2107_p7 = scmp.lt.s32.totalorder %s2397_s7, %s2105_s14 }
  0x59   : > { %p2102_p11 = pnand %p2100_p9, %p2086_p12  ;;  %p2108_p4 = scmp.lt.s32.totalorder %s2106_s10, %s2099_s15 }
  0x5b   : > { %p2103_p0 = pneg %p2102_p11  ;;  %p2109_p13 = por %p2108_p4, %p2107_p7 }
  0x5d   : > { %p2110_p6 = pnand %p2109_p13, %p2103_p0 }
  0x5f   : > { %2113 = shalt.err (!%p2110_p6)
}
  0x60   : > { %s2207_s13 = smov 128   ;;  %s2208_s25 = smov 8  }
  0x61   : > { %1943 = dma.hbm_to_vmem [thread:$0]  (!%p2393_p2), %s2389_s24, 8192, %s2397_s7, %s2399_s11, %s2207_s13, %s2207_s13, %s2208_s25  }
  0x62   : > { %245 = sbr.rel (%p2296_p8) target bundleno = 720 (0x2d0), region = 40  ;;  %s2430_s16 = sand.u32 (!%p2296_p8), 1, %s2184_s19  }
  0x63   : > { %s1652_s17 = sshll.u32 (!%p2296_p8), %s2430_s16, 9  ;;  %s248_s15 = scalar_lea.sflag (!%p2296_p8), [#allocation4], %s2430_s16 }
  0x64   : > { %s2436_s27 = scalar_lea.vmem (!%p2296_p8), [#allocation3], %s1652_s17  ;;  %p2869_p7 = scmp.ne.s32.totalorder (!%p2296_p8), %s2863_s28, 0 }
  0x69   : > { %2167 = dma.done.wait (%p2869_p7), %s248_s15, 8192  }
  0x6a   : > { %2169 = vsyncadd (%p2869_p7), %s248_s15, 4294959104  ;;  %p2870_p2 = scmp.ne.s32.totalorder %s2861_s26, 0 }
  0x6c   : > { %2171 = dma.done.wait (%p2870_p2), [#allocation7], 2048  }
  0x6d   : > { %2173 = vsyncadd (%p2870_p2), [#allocation7], 4294965248  ;;  %v2010_v0 = vld [vmem:[#allocation6] sm:$0xff]   ;;  %v2011_v1 = vld [vmem:[#allocation6 + $0x8] sm:$0xff]   ;;  %s2607_s7 = scalar_lea.vmem [#allocation9], %s1652_s17  ;;  %s1680_s9 = sshll.u32 %s2192_s21, 13 }
  0x6e   : > { %1761 = vmatprep.subr.bf16.mxu0 %v2010_v0  ;;  %v2012_v2 = vld [vmem:[#allocation6 + $0x10] sm:$0xff]   ;;  %v2013_v3 = vld [vmem:[#allocation6 + $0x18] sm:$0xff]   ;;  %v293_v4 = vld [vmem:[%s2436_s27] sm:$0xff]  ;;  %s1540_s11 = sshll.u32 %s2607_s7, 4  ;;  %s2797_s13 = scalar_lea.hbm %s2856_s5, %s1680_s9  ;;  %s2799_s11 = int_to_ptr.vmem [resolvable:$true] %s1540_s11 }
  0x6f   : > { %1762 = vmatpush3.bf16.msra.mxu0 %v2010_v0  ;;  %v294_v5 = vld [vmem:[%s2436_s27 + $0x8] sm:$0xff]  ;;  %v2014_v7 = vld [vmem:[#allocation6 + $0x20] sm:$0xff]   ;;  %v2016_v9 = vld [vmem:[#allocation6 + $0x30] sm:$0xff]   ;;  %s1526_s21 = scalar_lea.sflag [#allocation5], %s2430_s16  ;;  %s2114_s25 = scalar_lea.vmem %s2799_s11, 8192 }
  0x70   : > { %1763 = vmatprep.subr.bf16.mxu0 %v2011_v1  ;;  %v357_v6 = vpack.c.bf16 %v294_v5, %v293_v4  ;;  %v2015_v8 = vld [vmem:[#allocation6 + $0x28] sm:$0xff]   ;;  %v2017_v10 = vld [vmem:[#allocation6 + $0x38] sm:$0xff]   ;;  %v2449_v11 = vld [vmem:[%s2436_s27 + $0x10] sm:$0xff]  ;;  %p2115_p8 = scmp.ne.s32.totalorder %s2799_s11, %s2114_s25  ;;  %p2871_p12 = scmp.ne.s32.totalorder %s2867_s8, 0 }
  0x71   : > { %v2452_v12 = vld [vmem:[%s2436_s27 + $0x18] sm:$0xff]  ;;  %v2455_v13 = vld [vmem:[%s2436_s27 + $0x20] sm:$0xff]  ;;  %v298_v14 = vld [vmem:[%s2436_s27 + $0x28] sm:$0xff]  ;;  %s2209_s17 = smov [#allocation9]  }
  0x72   : > { %1777 = vmatprep.mubr.bf16.mxu0 %v357_v6  ;;  %v358_v15 = vpack.c.bf16 %v2452_v12, %v2449_v11  ;;  %v2018_v16 = vld [vmem:[#allocation8] sm:$0xff]   ;;  %v359_v17 = vpack.c.bf16 %v298_v14, %v2455_v13  ;;  %v2019_v18 = vld [vmem:[#allocation8 + $0x8] sm:$0xff]   ;;  %v2462_v19 = vld [vmem:[%s2436_s27 + $0x30] sm:$0xff]  ;;  %p2116_p1 = pnand %p2115_p8, %p2871_p12  ;;  %s2118_s15 = sshll.u32 %s2209_s17, 4  ;;  %s2119_s15 = int_to_ptr.vmem [resolvable:$false] %s2118_s15 }
  0x73   : > { %1764 = vmatpush3.bf16.msra.mxu0 %v2011_v1  ;;  %1841 = vmatprep.subr.bf16.mxu1 %v2018_v16  ;;  %v2465_v20 = vld [vmem:[%s2436_s27 + $0x38] sm:$0xff]  ;;  %v2020_v21 = vld [vmem:[#allocation8 + $0x10] sm:$0xff]   ;;  %v301_v22 = vld [vmem:[%s2436_s27 + $0x40] sm:$0xff]  ;;  %p2121_p3 = scmp.lt.s32.totalorder %s2799_s11, %s2119_s15 }
  0x74   : > { %1765 = vmatprep.subr.bf16.mxu0 %v2012_v2  ;;  %1842 = vmatpush3.bf16.msra.mxu1 %v2018_v16  ;;  %v302_v23 = vld [vmem:[%s2436_s27 + $0x48] sm:$0xff]  ;;  %v360_v24 = vpack.c.bf16 %v2465_v20, %v2462_v19  ;;  %v2021_v25 = vld [vmem:[#allocation8 + $0x18] sm:$0xff]   ;;  %v2022_v27 = vld [vmem:[#allocation8 + $0x20] sm:$0xff]   ;;  %p2117_p10 = pneg %p2116_p1 }
  0x75   : > { %1843 = vmatprep.subr.bf16.mxu1 %v2019_v18  ;;  %v361_v26 = vpack.c.bf16 %v302_v23, %v301_v22  ;;  %v303_v28 = vld [vmem:[%s2436_s27 + $0x50] sm:$0xff]  ;;  %v304_v29 = vld [vmem:[%s2436_s27 + $0x58] sm:$0xff]  ;;  %v305_v30 = vld [vmem:[%s2436_s27 + $0x60] sm:$0xff] }
  0x76   : > { %v306_v31 = vld [vmem:[%s2436_s27 + $0x68] sm:$0xff]  ;;  %v362_v32 = vpack.c.bf16 %v304_v29, %v303_v28  ;;  %v307_v34 = vld [vmem:[%s2436_s27 + $0x70] sm:$0xff]  ;;  %v308_v35 = vld [vmem:[%s2436_s27 + $0x78] sm:$0xff] }
  0x77   : > { %1766 = vmatpush3.bf16.msra.mxu0 %v2012_v2  ;;  %v363_v33 = vpack.c.bf16 %v306_v31, %v305_v30  ;;  %v309_v36 = vld [vmem:[%s2436_s27 + $0x80] sm:$0xff]  ;;  %v310_v37 = vld [vmem:[%s2436_s27 + $0x88] sm:$0xff]  ;;  %v364_v38 = vpack.c.bf16 %v308_v35, %v307_v34  ;;  %v311_v40 = vld [vmem:[%s2436_s27 + $0x90] sm:$0xff] }
  0x78   : > { %1767 = vmatprep.subr.bf16.mxu0 %v2013_v3  ;;  %1844 = vmatpush3.bf16.msra.mxu1 %v2019_v18  ;;  %v365_v39 = vpack.c.bf16 %v310_v37, %v309_v36  ;;  %v312_v41 = vld [vmem:[%s2436_s27 + $0x98] sm:$0xff]  ;;  %v313_v42 = vld [vmem:[%s2436_s27 + $0xa0] sm:$0xff]  ;;  %v314_v43 = vld [vmem:[%s2436_s27 + $0xa8] sm:$0xff] }
  0x79   : > { %1845 = vmatprep.subr.bf16.mxu1 %v2020_v21  ;;  %v366_v44 = vpack.c.bf16 %v312_v41, %v311_v40  ;;  %v367_v45 = vpack.c.bf16 %v314_v43, %v313_v42  ;;  %v315_v46 = vld [vmem:[%s2436_s27 + $0xb0] sm:$0xff]  ;;  %v316_v47 = vld [vmem:[%s2436_s27 + $0xb8] sm:$0xff]  ;;  %v317_v48 = vld [vmem:[%s2436_s27 + $0xc0] sm:$0xff] }
  0x7a   : > { %v318_v49 = vld [vmem:[%s2436_s27 + $0xc8] sm:$0xff]  ;;  %v368_v50 = vpack.c.bf16 %v316_v47, %v315_v46  ;;  %v319_v52 = vld [vmem:[%s2436_s27 + $0xd0] sm:$0xff]  ;;  %v320_v53 = vld [vmem:[%s2436_s27 + $0xd8] sm:$0xff] }
  0x7b   : > { %1768 = vmatpush3.bf16.msra.mxu0 %v2013_v3  ;;  %v369_v51 = vpack.c.bf16 %v318_v49, %v317_v48  ;;  %v321_v54 = vld [vmem:[%s2436_s27 + $0xe0] sm:$0xff]  ;;  %v322_v55 = vld [vmem:[%s2436_s27 + $0xe8] sm:$0xff]  ;;  %v370_v56 = vpack.c.bf16 %v320_v53, %v319_v52  ;;  %v323_v58 = vld [vmem:[%s2436_s27 + $0xf0] sm:$0xff] }
  0x7c   : > { %1769 = vmatprep.subr.bf16.mxu0 %v2014_v7  ;;  %1846 = vmatpush3.bf16.msra.mxu1 %v2020_v21  ;;  %v371_v57 = vpack.c.bf16 %v322_v55, %v321_v54  ;;  %v324_v59 = vld [vmem:[%s2436_s27 + $0xf8] sm:$0xff]  ;;  %v325_v60 = vld [vmem:[%s2436_s27 + $0x100] sm:$0xff]  ;;  %v326_v61 = vld [vmem:[%s2436_s27 + $0x108] sm:$0xff] }
  0x7d   : > { %1847 = vmatprep.subr.bf16.mxu1 %v2021_v25  ;;  %v372_v62 = vpack.c.bf16 %v324_v59, %v323_v58  ;;  %v373_v63 = vpack.c.bf16 %v326_v61, %v325_v60  ;;  %v327_v0 = vld [vmem:[%s2436_s27 + $0x110] sm:$0xff]  ;;  %v328_v1 = vld [vmem:[%s2436_s27 + $0x118] sm:$0xff]  ;;  %v329_v2 = vld [vmem:[%s2436_s27 + $0x120] sm:$0xff] }
  0x7e   : > { %v330_v3 = vld [vmem:[%s2436_s27 + $0x128] sm:$0xff]  ;;  %v374_v4 = vpack.c.bf16 %v328_v1, %v327_v0  ;;  %v331_v6 = vld [vmem:[%s2436_s27 + $0x130] sm:$0xff]  ;;  %v336_v16 = vld [vmem:[%s2436_s27 + $0x158] sm:$0xff] }
  0x7f   : > { %1770 = vmatpush3.bf16.msra.mxu0 %v2014_v7  ;;  %v375_v5 = vpack.c.bf16 %v330_v3, %v329_v2  ;;  %v332_v7 = vld [vmem:[%s2436_s27 + $0x138] sm:$0xff]  ;;  %v338_v18 = vld [vmem:[%s2436_s27 + $0x168] sm:$0xff]  ;;  %v339_v23 = vld [vmem:[%s2436_s27 + $0x170] sm:$0xff] }
  0x80   : > { %1771 = vmatprep.subr.bf16.mxu0 %v2015_v8  ;;  %1848 = vmatpush3.bf16.msra.mxu1 %v2021_v25  ;;  %v341_v25 = vld [vmem:[%s2436_s27 + $0x180] sm:$0xff]  ;;  %v2024_v30 = vld [vmem:[#allocation8 + $0x30] sm:$0xff]   ;;  %v346_v34 = vld [vmem:[%s2436_s27 + $0x1a8] sm:$0xff] }
  0x81   : > { %1849 = vmatprep.subr.bf16.mxu1 %v2022_v27  ;;  %v343_v31 = vld [vmem:[%s2436_s27 + $0x190] sm:$0xff]  ;;  %v2025_v35 = vld [vmem:[#allocation8 + $0x38] sm:$0xff]   ;;  %v349_v40 = vld [vmem:[%s2436_s27 + $0x1c0] sm:$0xff] }
  0x82   : > { %v350_v41 = vld [vmem:[%s2436_s27 + $0x1c8] sm:$0xff]  ;;  %v353_v46 = vld [vmem:[%s2436_s27 + $0x1e0] sm:$0xff] }
  0x83   : > { %1772 = vmatpush3.bf16.msra.mxu0 %v2015_v8  ;;  %v333_v8 = vld [vmem:[%s2436_s27 + $0x140] sm:$0xff]  ;;  %v385_v43 = vpack.c.bf16 %v350_v41, %v349_v40  ;;  %v354_v47 = vld [vmem:[%s2436_s27 + $0x1e8] sm:$0xff] }
  0x84   : > { %1773 = vmatprep.subr.bf16.mxu0 %v2016_v9  ;;  %1850 = vmatpush3.bf16.msra.mxu1 %v2022_v27  ;;  %v2023_v27 = vld [vmem:[#allocation8 + $0x28] sm:$0xff]   ;;  %v387_v49 = vpack.c.bf16 %v354_v47, %v353_v46  ;;  %v2528_v53 = vld [vmem:[%s2853_s2] ss:$0 sm:$0xff] }
  0x85   : > { %1851 = vmatprep.subr.bf16.mxu1 %v2023_v27 }
  0x87   : > { %1774 = vmatpush3.bf16.msra.mxu0 %v2016_v9  ;;  %v334_v9 = vld [vmem:[%s2436_s27 + $0x148] sm:$0xff] }
  0x88   : > { %1775 = vmatprep.subr.bf16.mxu0 %v2017_v10  ;;  %v377_v14 = vpack.c.bf16 %v334_v9, %v333_v8  ;;  %1852 = vmatpush3.bf16.msra.mxu1 %v2023_v27 }
  0x89   : > { %1853 = vmatprep.subr.bf16.mxu1 %v2024_v30 }
  0x8b   : > { %1776 = vmatpush3.bf16.msra.mxu0 %v2017_v10  ;;  %v376_v10 = vpack.c.bf16 %v332_v7, %v331_v6 }
  0x8c   : > { %1854 = vmatpush3.bf16.msra.mxu1 %v2024_v30 }
  0x8d   : > { %1855 = vmatprep.subr.bf16.mxu1 %v2025_v35 }
  0x8e   : > { %1778 = vmatmul.mubr.bf16.vlgmr.msra.gmra.mrb[0].mxu0 %v358_v15  ;;  %v335_v15 = vld [vmem:[%s2436_s27 + $0x150] sm:$0xff] }
  0x8f   : > { %1781 = vmatprep.mubr.bf16.mxu0 %v359_v17  ;;  %v337_v17 = vld [vmem:[%s2436_s27 + $0x160] sm:$0xff]  ;;  %v378_v21 = vpack.c.bf16 %v336_v16, %v335_v15 }
  0x90   : > { %v379_v22 = vpack.c.bf16 %v338_v18, %v337_v17  ;;  %1856 = vmatpush3.bf16.msra.mxu1 %v2025_v35 }
  0x96   : > { %1782 = vmatmul.mubr.bf16.gmra.mrb[4].mxu0 %v360_v24  ;;  %v340_v24 = vld [vmem:[%s2436_s27 + $0x178] sm:$0xff] }
  0x97   : > { %1785 = vmatprep.mubr.bf16.mxu0 %v361_v26  ;;  %v342_v26 = vld [vmem:[%s2436_s27 + $0x188] sm:$0xff]  ;;  %v380_v28 = vpack.c.bf16 %v340_v24, %v339_v23 }
  0x98   : > { %v381_v29 = vpack.c.bf16 %v342_v26, %v341_v25 }
  0x9e   : > { %1786 = vmatmul.mubr.bf16.gmra.mrb[8].mxu0 %v362_v32  ;;  %v344_v32 = vld [vmem:[%s2436_s27 + $0x198] sm:$0xff] }
  0x9f   : > { %1789 = vmatprep.mubr.bf16.mxu0 %v363_v33  ;;  %v345_v33 = vld [vmem:[%s2436_s27 + $0x1a0] sm:$0xff]  ;;  %v382_v36 = vpack.c.bf16 %v344_v32, %v343_v31 }
  0xa0   : > { %v383_v37 = vpack.c.bf16 %v346_v34, %v345_v33 }
  0xa6   : > { %1790 = vmatmul.mubr.bf16.gmra.mrb[12].mxu0 %v364_v38  ;;  %v347_v38 = vld [vmem:[%s2436_s27 + $0x1b0] sm:$0xff] }
  0xa7   : > { %1793 = vmatprep.mubr.bf16.mxu0 %v365_v39  ;;  %v348_v39 = vld [vmem:[%s2436_s27 + $0x1b8] sm:$0xff] }
  0xa8   : > { %v384_v42 = vpack.c.bf16 %v348_v39, %v347_v38 }
  0xae   : > { %1794 = vmatmul.mubr.bf16.gmra.mrb[16].mxu0 %v366_v44  ;;  %v351_v44 = vld [vmem:[%s2436_s27 + $0x1d0] sm:$0xff] }
  0xaf   : > { %1797 = vmatprep.mubr.bf16.mxu0 %v367_v45  ;;  %v352_v45 = vld [vmem:[%s2436_s27 + $0x1d8] sm:$0xff] }
  0xb0   : > { %v386_v48 = vpack.c.bf16 %v352_v45, %v351_v44 }
  0xb6   : > { %1798 = vmatmul.mubr.bf16.gmra.mrb[20].mxu0 %v368_v50  ;;  %v355_v50 = vld [vmem:[%s2436_s27 + $0x1f0] sm:$0xff] }
  0xb7   : > { %1801 = vmatprep.mubr.bf16.mxu0 %v369_v51  ;;  %v356_v51 = vld [vmem:[%s2436_s27 + $0x1f8] sm:$0xff] }
  0xb8   : > { %v388_v52 = vpack.c.bf16 %v356_v51, %v355_v50 }
  0xbe   : > { %1802 = vmatmul.mubr.bf16.gmra.mrb[24].mxu0 %v370_v56 }
  0xbf   : > { %1805 = vmatprep.mubr.bf16.mxu0 %v371_v57 }
  0xc6   : > { %1806 = vmatmul.mubr.bf16.gmra.mrb[28].mxu0 %v372_v62 }
  0xc7   : > { %1809 = vmatprep.mubr.bf16.mxu0 %v373_v63 }
  0xce   : > { %1810 = vmatmul.mubr.bf16.gmra.mrb[32].mxu0 %v374_v4 }
  0xcf   : > { %1813 = vmatprep.mubr.bf16.mxu0 %v375_v5 }
  0xd6   : > { %1814 = vmatmul.mubr.bf16.gmra.mrb[36].mxu0 %v376_v10 }
  0xd7   : > { %1817 = vmatprep.mubr.bf16.mxu0 %v377_v14 }
  0xde   : > { %1818 = vmatmul.mubr.bf16.gmra.mrb[40].mxu0 %v378_v21 }
  0xdf   : > { %1821 = vmatprep.mubr.bf16.mxu0 %v379_v22 }
  0xe6   : > { %1822 = vmatmul.mubr.bf16.gmra.mrb[44].mxu0 %v380_v28 }
  0xe7   : > { %1825 = vmatprep.mubr.bf16.mxu0 %v381_v29 }
  0xee   : > { %1826 = vmatmul.mubr.bf16.gmra.mrb[48].mxu0 %v382_v36 }
  0xef   : > { %1829 = vmatprep.mubr.bf16.mxu0 %v383_v37 }
  0xf6   : > { %1830 = vmatmul.mubr.bf16.gmra.mrb[52].mxu0 %v384_v42 }
  0xf7   : > { %1833 = vmatprep.mubr.bf16.mxu0 %v385_v43 }
  0xfe   : > { %1834 = vmatmul.mubr.bf16.gmra.mrb[56].mxu0 %v386_v48 }
  0xff   : > { %1837 = vmatprep.mubr.bf16.mxu0 %v387_v49 }
 0x106   : > { %1838 = vmatmul.mubr.bf16.gmra.mrb[60].mxu0 %v388_v52 }
 0x161   : > { %v1779_v54 = vpop.f32.mrb[0].mxu0 }
 0x162   : > { %v503_v55 = vadd.f32 %v1779_v54, %v2528_v53  ;;  %v494_v56 = vpop.f32.mrb[1].mxu0 }
 0x163   : > { %v495_v57 = vadd.f32 %v2528_v53, %v494_v56  ;;  %v1780_v58 = vpop.f32.mrb[2].mxu0 }
 0x164   : > { %v751_v59 = vmul.f32 0.01, %v503_v55  ;;  %v506_v60 = vadd.f32 %v1780_v58, %v2528_v53  ;;  %v497_v61 = vpop.f32.mrb[3].mxu0 }
 0x165   : > { %v749_v62 = vmul.f32 0.01, %v495_v57  ;;  %v498_v63 = vadd.f32 %v2528_v53, %v497_v61 }
 0x166   : > { %v752_v0 = vmul.f32 0.01, %v506_v60  ;;  %v815_v2 = vmax.f32 %v503_v55, %v751_v59 }
 0x167   : > { %v750_v1 = vmul.f32 0.01, %v498_v63  ;;  %v813_v5 = vmax.f32 %v495_v57, %v749_v62 }
 0x168   : > { %v816_v3 = vmax.f32 %v506_v60, %v752_v0 }
 0x169   : > { %v1783_v4 = vpop.f32.mrb[4].mxu0  ;;  %v814_v6 = vmax.f32 %v498_v63, %v750_v1 }
 0x16a   : > { %v519_v7 = vadd.f32 %v1783_v4, %v2528_v53  ;;  %v510_v8 = vpop.f32.mrb[5].mxu0  ;;  %v878_v9 = vpack.c.bf16 %v816_v3, %v815_v2 }
 0x16b   : > { %v511_v10 = vadd.f32 %v2528_v53, %v510_v8  ;;  %v1784_v14 = vpop.f32.mrb[6].mxu0  ;;  %v877_v15 = vpack.c.bf16 %v814_v6, %v813_v5 }
 0x16c   : > { %v755_v16 = vmul.f32 0.01, %v519_v7  ;;  %v522_v17 = vadd.f32 %v1784_v14, %v2528_v53  ;;  %v513_v18 = vpop.f32.mrb[7].mxu0 }
 0x16d   : > { %v753_v21 = vmul.f32 0.01, %v511_v10  ;;  %v514_v22 = vadd.f32 %v2528_v53, %v513_v18  ;;  %1857 = vmatprep.mubr.bf16.mxu1 %v877_v15 }
 0x16e   : > { %v756_v23 = vmul.f32 0.01, %v522_v17  ;;  %1858 = vmatmul.mubr.bf16.vlgmr.msra.gmra.mrb[0].mxu1 %v878_v9  ;;  %v819_v25 = vmax.f32 %v519_v7, %v755_v16 }
 0x16f   : > { %v754_v24 = vmul.f32 0.01, %v514_v22  ;;  %v817_v27 = vmax.f32 %v511_v10, %v753_v21 }
 0x170   : > { %v820_v26 = vmax.f32 %v522_v17, %v756_v23 }
 0x171   : > { %v818_v28 = vmax.f32 %v514_v22, %v754_v24  ;;  %v1787_v29 = vpop.f32.mrb[8].mxu0 }
 0x172   : > { %v535_v30 = vadd.f32 %v1787_v29, %v2528_v53  ;;  %v526_v31 = vpop.f32.mrb[9].mxu0  ;;  %v880_v32 = vpack.c.bf16 %v820_v26, %v819_v25 }
 0x173   : > { %v527_v33 = vadd.f32 %v2528_v53, %v526_v31  ;;  %v1788_v34 = vpop.f32.mrb[10].mxu0  ;;  %v879_v35 = vpack.c.bf16 %v818_v28, %v817_v27 }
 0x174   : > { %v759_v36 = vmul.f32 0.01, %v535_v30  ;;  %v538_v37 = vadd.f32 %v1788_v34, %v2528_v53  ;;  %v529_v38 = vpop.f32.mrb[11].mxu0 }
 0x175   : > { %v757_v39 = vmul.f32 0.01, %v527_v33  ;;  %v530_v40 = vadd.f32 %v2528_v53, %v529_v38  ;;  %1861 = vmatprep.mubr.bf16.mxu1 %v879_v35 }
 0x176   : > { %v760_v41 = vmul.f32 0.01, %v538_v37  ;;  %1862 = vmatmul.mubr.bf16.gmra.mrb[4].mxu1 %v880_v32  ;;  %v823_v43 = vmax.f32 %v535_v30, %v759_v36 }
 0x177   : > { %v758_v42 = vmul.f32 0.01, %v530_v40  ;;  %v821_v45 = vmax.f32 %v527_v33, %v757_v39 }
 0x178   : > { %v824_v44 = vmax.f32 %v538_v37, %v760_v41 }
 0x179   : > { %v822_v46 = vmax.f32 %v530_v40, %v758_v42  ;;  %v1791_v47 = vpop.f32.mrb[12].mxu0 }
 0x17a   : > { %v551_v48 = vadd.f32 %v1791_v47, %v2528_v53  ;;  %v542_v49 = vpop.f32.mrb[13].mxu0  ;;  %v882_v50 = vpack.c.bf16 %v824_v44, %v823_v43 }
 0x17b   : > { %v543_v51 = vadd.f32 %v2528_v53, %v542_v49  ;;  %v1792_v52 = vpop.f32.mrb[14].mxu0  ;;  %v881_v54 = vpack.c.bf16 %v822_v46, %v821_v45 }
 0x17c   : > { %v763_v55 = vmul.f32 0.01, %v551_v48  ;;  %v554_v56 = vadd.f32 %v1792_v52, %v2528_v53  ;;  %v545_v57 = vpop.f32.mrb[15].mxu0 }
 0x17d   : > { %v761_v58 = vmul.f32 0.01, %v543_v51  ;;  %v546_v59 = vadd.f32 %v2528_v53, %v545_v57  ;;  %1865 = vmatprep.mubr.bf16.mxu1 %v881_v54 }
 0x17e   : > { %v764_v60 = vmul.f32 0.01, %v554_v56  ;;  %1866 = vmatmul.mubr.bf16.gmra.mrb[8].mxu1 %v882_v50  ;;  %v827_v62 = vmax.f32 %v551_v48, %v763_v55 }
 0x17f   : > { %v762_v61 = vmul.f32 0.01, %v546_v59  ;;  %v825_v0 = vmax.f32 %v543_v51, %v761_v58 }
 0x180   : > { %v828_v63 = vmax.f32 %v554_v56, %v764_v60 }
 0x181   : > { %v826_v1 = vmax.f32 %v546_v59, %v762_v61  ;;  %v1795_v2 = vpop.f32.mrb[16].mxu0 }
 0x182   : > { %v567_v3 = vadd.f32 %v1795_v2, %v2528_v53  ;;  %v558_v4 = vpop.f32.mrb[17].mxu0  ;;  %v884_v5 = vpack.c.bf16 %v828_v63, %v827_v62 }
 0x183   : > { %v559_v6 = vadd.f32 %v2528_v53, %v558_v4  ;;  %v1796_v7 = vpop.f32.mrb[18].mxu0  ;;  %v883_v8 = vpack.c.bf16 %v826_v1, %v825_v0 }
 0x184   : > { %v767_v9 = vmul.f32 0.01, %v567_v3  ;;  %v570_v10 = vadd.f32 %v1796_v7, %v2528_v53  ;;  %v561_v14 = vpop.f32.mrb[19].mxu0 }
 0x185   : > { %v765_v15 = vmul.f32 0.01, %v559_v6  ;;  %v562_v16 = vadd.f32 %v2528_v53, %v561_v14  ;;  %1869 = vmatprep.mubr.bf16.mxu1 %v883_v8 }
 0x186   : > { %v768_v17 = vmul.f32 0.01, %v570_v10  ;;  %1870 = vmatmul.mubr.bf16.gmra.mrb[12].mxu1 %v884_v5  ;;  %v831_v21 = vmax.f32 %v567_v3, %v767_v9 }
 0x187   : > { %v766_v18 = vmul.f32 0.01, %v562_v16  ;;  %v829_v23 = vmax.f32 %v559_v6, %v765_v15 }
 0x188   : > { %v832_v22 = vmax.f32 %v570_v10, %v768_v17 }
 0x189   : > { %v830_v24 = vmax.f32 %v562_v16, %v766_v18  ;;  %v1799_v25 = vpop.f32.mrb[20].mxu0 }
 0x18a   : > { %v583_v26 = vadd.f32 %v1799_v25, %v2528_v53  ;;  %v574_v27 = vpop.f32.mrb[21].mxu0  ;;  %v886_v28 = vpack.c.bf16 %v832_v22, %v831_v21 }
 0x18b   : > { %v575_v29 = vadd.f32 %v2528_v53, %v574_v27  ;;  %v1800_v30 = vpop.f32.mrb[22].mxu0  ;;  %v885_v31 = vpack.c.bf16 %v830_v24, %v829_v23 }
 0x18c   : > { %v771_v32 = vmul.f32 0.01, %v583_v26  ;;  %v586_v33 = vadd.f32 %v1800_v30, %v2528_v53  ;;  %v577_v34 = vpop.f32.mrb[23].mxu0 }
 0x18d   : > { %v769_v35 = vmul.f32 0.01, %v575_v29  ;;  %v578_v36 = vadd.f32 %v2528_v53, %v577_v34  ;;  %1873 = vmatprep.mubr.bf16.mxu1 %v885_v31 }
 0x18e   : > { %v772_v37 = vmul.f32 0.01, %v586_v33  ;;  %1874 = vmatmul.mubr.bf16.gmra.mrb[16].mxu1 %v886_v28  ;;  %v835_v39 = vmax.f32 %v583_v26, %v771_v32 }
 0x18f   : > { %v770_v38 = vmul.f32 0.01, %v578_v36  ;;  %v833_v41 = vmax.f32 %v575_v29, %v769_v35 }
 0x190   : > { %v836_v40 = vmax.f32 %v586_v33, %v772_v37 }
 0x191   : > { %v834_v42 = vmax.f32 %v578_v36, %v770_v38  ;;  %v1803_v43 = vpop.f32.mrb[24].mxu0 }
 0x192   : > { %v599_v44 = vadd.f32 %v1803_v43, %v2528_v53  ;;  %v590_v45 = vpop.f32.mrb[25].mxu0  ;;  %v888_v46 = vpack.c.bf16 %v836_v40, %v835_v39 }
 0x193   : > { %v591_v47 = vadd.f32 %v2528_v53, %v590_v45  ;;  %v1804_v48 = vpop.f32.mrb[26].mxu0  ;;  %v887_v49 = vpack.c.bf16 %v834_v42, %v833_v41 }
 0x194   : > { %v775_v50 = vmul.f32 0.01, %v599_v44  ;;  %v602_v51 = vadd.f32 %v1804_v48, %v2528_v53  ;;  %v593_v52 = vpop.f32.mrb[27].mxu0 }
 0x195   : > { %v773_v54 = vmul.f32 0.01, %v591_v47  ;;  %v594_v55 = vadd.f32 %v2528_v53, %v593_v52  ;;  %1877 = vmatprep.mubr.bf16.mxu1 %v887_v49 }
 0x196   : > { %v776_v56 = vmul.f32 0.01, %v602_v51  ;;  %1878 = vmatmul.mubr.bf16.gmra.mrb[20].mxu1 %v888_v46  ;;  %v839_v58 = vmax.f32 %v599_v44, %v775_v50 }
 0x197   : > { %v774_v57 = vmul.f32 0.01, %v594_v55  ;;  %v837_v60 = vmax.f32 %v591_v47, %v773_v54 }
 0x198   : > { %v840_v59 = vmax.f32 %v602_v51, %v776_v56 }
 0x199   : > { %v838_v61 = vmax.f32 %v594_v55, %v774_v57  ;;  %v1807_v62 = vpop.f32.mrb[28].mxu0 }
 0x19a   : > { %v615_v63 = vadd.f32 %v1807_v62, %v2528_v53  ;;  %v606_v0 = vpop.f32.mrb[29].mxu0  ;;  %v890_v1 = vpack.c.bf16 %v840_v59, %v839_v58 }
 0x19b   : > { %v607_v2 = vadd.f32 %v2528_v53, %v606_v0  ;;  %v1808_v3 = vpop.f32.mrb[30].mxu0  ;;  %v889_v4 = vpack.c.bf16 %v838_v61, %v837_v60 }
 0x19c   : > { %v779_v5 = vmul.f32 0.01, %v615_v63  ;;  %v618_v6 = vadd.f32 %v1808_v3, %v2528_v53  ;;  %v609_v7 = vpop.f32.mrb[31].mxu0 }
 0x19d   : > { %v777_v8 = vmul.f32 0.01, %v607_v2  ;;  %v610_v9 = vadd.f32 %v2528_v53, %v609_v7  ;;  %1881 = vmatprep.mubr.bf16.mxu1 %v889_v4 }
 0x19e   : > { %v780_v10 = vmul.f32 0.01, %v618_v6  ;;  %1882 = vmatmul.mubr.bf16.gmra.mrb[24].mxu1 %v890_v1  ;;  %v843_v15 = vmax.f32 %v615_v63, %v779_v5 }
 0x19f   : > { %v778_v14 = vmul.f32 0.01, %v610_v9  ;;  %v841_v17 = vmax.f32 %v607_v2, %v777_v8 }
 0x1a0   : > { %v844_v16 = vmax.f32 %v618_v6, %v780_v10 }
 0x1a1   : > { %v842_v18 = vmax.f32 %v610_v9, %v778_v14  ;;  %v1811_v21 = vpop.f32.mrb[32].mxu0 }
 0x1a2   : > { %v631_v22 = vadd.f32 %v1811_v21, %v2528_v53  ;;  %v622_v23 = vpop.f32.mrb[33].mxu0  ;;  %v892_v24 = vpack.c.bf16 %v844_v16, %v843_v15 }
 0x1a3   : > { %v623_v25 = vadd.f32 %v2528_v53, %v622_v23  ;;  %v1812_v26 = vpop.f32.mrb[34].mxu0  ;;  %v891_v27 = vpack.c.bf16 %v842_v18, %v841_v17 }
 0x1a4   : > { %v783_v28 = vmul.f32 0.01, %v631_v22  ;;  %v634_v29 = vadd.f32 %v1812_v26, %v2528_v53  ;;  %v625_v30 = vpop.f32.mrb[35].mxu0 }
 0x1a5   : > { %v781_v31 = vmul.f32 0.01, %v623_v25  ;;  %v626_v32 = vadd.f32 %v2528_v53, %v625_v30  ;;  %1885 = vmatprep.mubr.bf16.mxu1 %v891_v27 }
 0x1a6   : > { %v784_v33 = vmul.f32 0.01, %v634_v29  ;;  %1886 = vmatmul.mubr.bf16.gmra.mrb[28].mxu1 %v892_v24  ;;  %v847_v35 = vmax.f32 %v631_v22, %v783_v28 }
 0x1a7   : > { %v782_v34 = vmul.f32 0.01, %v626_v32  ;;  %v845_v37 = vmax.f32 %v623_v25, %v781_v31 }
 0x1a8   : > { %v848_v36 = vmax.f32 %v634_v29, %v784_v33 }
 0x1a9   : > { %v846_v38 = vmax.f32 %v626_v32, %v782_v34  ;;  %v1815_v39 = vpop.f32.mrb[36].mxu0 }
 0x1aa   : > { %v647_v40 = vadd.f32 %v1815_v39, %v2528_v53  ;;  %v638_v41 = vpop.f32.mrb[37].mxu0  ;;  %v894_v42 = vpack.c.bf16 %v848_v36, %v847_v35 }
 0x1ab   : > { %v639_v43 = vadd.f32 %v2528_v53, %v638_v41  ;;  %v1816_v44 = vpop.f32.mrb[38].mxu0  ;;  %v893_v45 = vpack.c.bf16 %v846_v38, %v845_v37 }
 0x1ac   : > { %v787_v46 = vmul.f32 0.01, %v647_v40  ;;  %v650_v47 = vadd.f32 %v1816_v44, %v2528_v53  ;;  %v641_v48 = vpop.f32.mrb[39].mxu0 }
 0x1ad   : > { %v785_v49 = vmul.f32 0.01, %v639_v43  ;;  %v642_v50 = vadd.f32 %v2528_v53, %v641_v48  ;;  %1889 = vmatprep.mubr.bf16.mxu1 %v893_v45 }
 0x1ae   : > { %v788_v51 = vmul.f32 0.01, %v650_v47  ;;  %1890 = vmatmul.mubr.bf16.gmra.mrb[32].mxu1 %v894_v42  ;;  %v851_v54 = vmax.f32 %v647_v40, %v787_v46 }
 0x1af   : > { %v786_v52 = vmul.f32 0.01, %v642_v50  ;;  %v849_v56 = vmax.f32 %v639_v43, %v785_v49 }
 0x1b0   : > { %v852_v55 = vmax.f32 %v650_v47, %v788_v51 }
 0x1b1   : > { %v850_v57 = vmax.f32 %v642_v50, %v786_v52  ;;  %v1819_v58 = vpop.f32.mrb[40].mxu0 }
 0x1b2   : > { %v663_v59 = vadd.f32 %v1819_v58, %v2528_v53  ;;  %v654_v60 = vpop.f32.mrb[41].mxu0  ;;  %v896_v61 = vpack.c.bf16 %v852_v55, %v851_v54 }
 0x1b3   : > { %v655_v62 = vadd.f32 %v2528_v53, %v654_v60  ;;  %v1820_v63 = vpop.f32.mrb[42].mxu0  ;;  %v895_v0 = vpack.c.bf16 %v850_v57, %v849_v56 }
 0x1b4   : > { %v791_v1 = vmul.f32 0.01, %v663_v59  ;;  %v666_v2 = vadd.f32 %v1820_v63, %v2528_v53  ;;  %v657_v3 = vpop.f32.mrb[43].mxu0 }
 0x1b5   : > { %v789_v4 = vmul.f32 0.01, %v655_v62  ;;  %v658_v5 = vadd.f32 %v2528_v53, %v657_v3  ;;  %1893 = vmatprep.mubr.bf16.mxu1 %v895_v0 }
 0x1b6   : > { %v792_v6 = vmul.f32 0.01, %v666_v2  ;;  %1894 = vmatmul.mubr.bf16.gmra.mrb[36].mxu1 %v896_v61  ;;  %v855_v8 = vmax.f32 %v663_v59, %v791_v1 }
 0x1b7   : > { %v790_v7 = vmul.f32 0.01, %v658_v5  ;;  %v853_v10 = vmax.f32 %v655_v62, %v789_v4 }
 0x1b8   : > { %v856_v9 = vmax.f32 %v666_v2, %v792_v6 }
 0x1b9   : > { %v854_v14 = vmax.f32 %v658_v5, %v790_v7  ;;  %v1823_v15 = vpop.f32.mrb[44].mxu0 }
 0x1ba   : > { %v679_v16 = vadd.f32 %v1823_v15, %v2528_v53  ;;  %v670_v17 = vpop.f32.mrb[45].mxu0  ;;  %v898_v18 = vpack.c.bf16 %v856_v9, %v855_v8 }
 0x1bb   : > { %v671_v21 = vadd.f32 %v2528_v53, %v670_v17  ;;  %v1824_v22 = vpop.f32.mrb[46].mxu0  ;;  %v897_v23 = vpack.c.bf16 %v854_v14, %v853_v10 }
 0x1bc   : > { %v795_v24 = vmul.f32 0.01, %v679_v16  ;;  %v682_v25 = vadd.f32 %v1824_v22, %v2528_v53  ;;  %v673_v26 = vpop.f32.mrb[47].mxu0 }
 0x1bd   : > { %v793_v27 = vmul.f32 0.01, %v671_v21  ;;  %v674_v28 = vadd.f32 %v2528_v53, %v673_v26  ;;  %1897 = vmatprep.mubr.bf16.mxu1 %v897_v23 }
 0x1be   : > { %v796_v29 = vmul.f32 0.01, %v682_v25  ;;  %1898 = vmatmul.mubr.bf16.gmra.mrb[40].mxu1 %v898_v18  ;;  %v859_v31 = vmax.f32 %v679_v16, %v795_v24 }
 0x1bf   : > { %v794_v30 = vmul.f32 0.01, %v674_v28  ;;  %v857_v33 = vmax.f32 %v671_v21, %v793_v27 }
 0x1c0   : > { %v860_v32 = vmax.f32 %v682_v25, %v796_v29 }
 0x1c1   : > { %v858_v34 = vmax.f32 %v674_v28, %v794_v30  ;;  %v1827_v35 = vpop.f32.mrb[48].mxu0 }
 0x1c2   : > { %v695_v36 = vadd.f32 %v1827_v35, %v2528_v53  ;;  %v686_v37 = vpop.f32.mrb[49].mxu0  ;;  %v900_v38 = vpack.c.bf16 %v860_v32, %v859_v31 }
 0x1c3   : > { %v687_v39 = vadd.f32 %v2528_v53, %v686_v37  ;;  %v1828_v40 = vpop.f32.mrb[50].mxu0  ;;  %v899_v41 = vpack.c.bf16 %v858_v34, %v857_v33 }
 0x1c4   : > { %v799_v42 = vmul.f32 0.01, %v695_v36  ;;  %v698_v43 = vadd.f32 %v1828_v40, %v2528_v53  ;;  %v689_v44 = vpop.f32.mrb[51].mxu0 }
 0x1c5   : > { %v797_v45 = vmul.f32 0.01, %v687_v39  ;;  %v690_v46 = vadd.f32 %v2528_v53, %v689_v44  ;;  %1901 = vmatprep.mubr.bf16.mxu1 %v899_v41 }
 0x1c6   : > { %v800_v47 = vmul.f32 0.01, %v698_v43  ;;  %1902 = vmatmul.mubr.bf16.gmra.mrb[44].mxu1 %v900_v38  ;;  %v863_v49 = vmax.f32 %v695_v36, %v799_v42 }
 0x1c7   : > { %v798_v48 = vmul.f32 0.01, %v690_v46  ;;  %v861_v51 = vmax.f32 %v687_v39, %v797_v45 }
 0x1c8   : > { %v864_v50 = vmax.f32 %v698_v43, %v800_v47 }
 0x1c9   : > { %v862_v52 = vmax.f32 %v690_v46, %v798_v48  ;;  %v1831_v54 = vpop.f32.mrb[52].mxu0 }
 0x1ca   : > { %v711_v55 = vadd.f32 %v1831_v54, %v2528_v53  ;;  %v702_v56 = vpop.f32.mrb[53].mxu0  ;;  %v902_v57 = vpack.c.bf16 %v864_v50, %v863_v49 }
 0x1cb   : > { %v703_v58 = vadd.f32 %v2528_v53, %v702_v56  ;;  %v1832_v59 = vpop.f32.mrb[54].mxu0  ;;  %v901_v60 = vpack.c.bf16 %v862_v52, %v861_v51  ;;  %v2597_v51 = vld [vmem:[%s2855_s4] ss:$0 sm:$0xff] }
 0x1cc   : > { %v803_v61 = vmul.f32 0.01, %v711_v55  ;;  %v714_v62 = vadd.f32 %v1832_v59, %v2528_v53  ;;  %v705_v63 = vpop.f32.mrb[55].mxu0 }
 0x1cd   : > { %v801_v0 = vmul.f32 0.01, %v703_v58  ;;  %v706_v1 = vadd.f32 %v2528_v53, %v705_v63  ;;  %1905 = vmatprep.mubr.bf16.mxu1 %v901_v60  ;;  %v2026_v60 = vld [vmem:[%s2436_s27] sm:$0xff] }
 0x1ce   : > { %v804_v2 = vmul.f32 0.01, %v714_v62  ;;  %1906 = vmatmul.mubr.bf16.gmra.mrb[48].mxu1 %v902_v57  ;;  %v867_v4 = vmax.f32 %v711_v55, %v803_v61 }
 0x1cf   : > { %v802_v3 = vmul.f32 0.01, %v706_v1  ;;  %v865_v6 = vmax.f32 %v703_v58, %v801_v0 }
 0x1d0   : > { %v868_v5 = vmax.f32 %v714_v62, %v804_v2 }
 0x1d1   : > { %v866_v7 = vmax.f32 %v706_v1, %v802_v3  ;;  %v1835_v8 = vpop.f32.mrb[56].mxu0 }
 0x1d2   : > { %v727_v9 = vadd.f32 %v1835_v8, %v2528_v53  ;;  %v718_v10 = vpop.f32.mrb[57].mxu0  ;;  %v904_v14 = vpack.c.bf16 %v868_v5, %v867_v4  ;;  %v1338_v8 = vld [vmem:[%s2436_s27 + $0x28] sm:$0xff] }
 0x1d3   : > { %v719_v15 = vadd.f32 %v2528_v53, %v718_v10  ;;  %v1836_v16 = vpop.f32.mrb[58].mxu0  ;;  %v903_v17 = vpack.c.bf16 %v866_v7, %v865_v6 }
 0x1d4   : > { %v807_v18 = vmul.f32 0.01, %v727_v9  ;;  %v730_v21 = vadd.f32 %v1836_v16, %v2528_v53  ;;  %v721_v22 = vpop.f32.mrb[59].mxu0  ;;  %v1343_v16 = vld [vmem:[%s2436_s27 + $0x50] sm:$0xff] }
 0x1d5   : > { %v805_v23 = vmul.f32 0.01, %v719_v15  ;;  %v722_v24 = vadd.f32 %v2528_v53, %v721_v22  ;;  %1909 = vmatprep.mubr.bf16.mxu1 %v903_v17 }
 0x1d6   : > { %v808_v25 = vmul.f32 0.01, %v730_v21  ;;  %1910 = vmatmul.mubr.bf16.gmra.mrb[52].mxu1 %v904_v14  ;;  %v871_v27 = vmax.f32 %v727_v9, %v807_v18 }
 0x1d7   : > { %v806_v26 = vmul.f32 0.01, %v722_v24  ;;  %v869_v29 = vmax.f32 %v719_v15, %v805_v23 }
 0x1d8   : > { %v872_v28 = vmax.f32 %v730_v21, %v808_v25 }
 0x1d9   : > { %v870_v30 = vmax.f32 %v722_v24, %v806_v26  ;;  %v1839_v31 = vpop.f32.mrb[60].mxu0  ;;  %v1342_v26 = vld [vmem:[%s2436_s27 + $0x48] sm:$0xff] }
 0x1da   : > { %v743_v32 = vadd.f32 %v1839_v31, %v2528_v53  ;;  %v734_v33 = vpop.f32.mrb[61].mxu0  ;;  %v906_v34 = vpack.c.bf16 %v872_v28, %v871_v27 }
 0x1db   : > { %v735_v35 = vadd.f32 %v2528_v53, %v734_v33  ;;  %v1840_v36 = vpop.f32.mrb[62].mxu0  ;;  %v905_v37 = vpack.c.bf16 %v870_v30, %v869_v29 }
 0x1dc   : > { %v811_v38 = vmul.f32 0.01, %v743_v32  ;;  %v746_v39 = vadd.f32 %v1840_v36, %v2528_v53  ;;  %v737_v40 = vpop.f32.mrb[63].mxu0 }
 0x1dd   : > { %v809_v41 = vmul.f32 0.01, %v735_v35  ;;  %v738_v42 = vadd.f32 %v2528_v53, %v737_v40  ;;  %1913 = vmatprep.mubr.bf16.mxu1 %v905_v37 }
 0x1de   : > { %v812_v43 = vmul.f32 0.01, %v746_v39  ;;  %1914 = vmatmul.mubr.bf16.gmra.mrb[56].mxu1 %v906_v34  ;;  %v875_v45 = vmax.f32 %v743_v32, %v811_v38  ;;  %v1347_v32 = vld [vmem:[%s2436_s27 + $0x70] sm:$0xff]  ;;  %v1348_v38 = vld [vmem:[%s2436_s27 + $0x78] sm:$0xff] }
 0x1df   : > { %v810_v44 = vmul.f32 0.01, %v738_v42  ;;  %v873_v47 = vmax.f32 %v735_v35, %v809_v41  ;;  %v1345_v35 = vld [vmem:[%s2436_s27 + $0x60] sm:$0xff] }
 0x1e0   : > { %v876_v46 = vmax.f32 %v746_v39, %v812_v43 }
 0x1e1   : > { %v874_v48 = vmax.f32 %v738_v42, %v810_v44  ;;  %v1346_v42 = vld [vmem:[%s2436_s27 + $0x68] sm:$0xff] }
 0x1e2   : > { %v908_v49 = vpack.c.bf16 %v876_v46, %v875_v45 }
 0x1e3   : > { %v907_v50 = vpack.c.bf16 %v874_v48, %v873_v47  ;;  %v1351_v48 = vld [vmem:[%s2436_s27 + $0x90] sm:$0xff] }
 0x1e5   : > { %1917 = vmatprep.mubr.bf16.mxu1 %v907_v50 }
 0x1e6   : > { %1918 = vmatmul.mubr.bf16.gmra.mrb[60].mxu1 %v908_v49 }
 0x241   : > { %v1859_v53 = vpop.f32.mrb[0].mxu1 }
 0x242   : > { %v1087_v52 = vadd.f32 %v1859_v53, %v2597_v51  ;;  %v1078_v54 = vpop.f32.mrb[1].mxu1  ;;  %v1349_v53 = vld [vmem:[%s2436_s27 + $0x80] sm:$0xff] }
 0x243   : > { %v1079_v55 = vadd.f32 %v2597_v51, %v1078_v54  ;;  %v1860_v56 = vpop.f32.mrb[2].mxu1 }
 0x244   : > { %v1399_v57 = vadd.f32 %v1087_v52, %v2449_v11  ;;  %v1090_v58 = vadd.f32 %v1860_v56, %v2597_v51  ;;  %v1081_v59 = vpop.f32.mrb[3].mxu1  ;;  %v2027_v11 = vld [vmem:[%s2436_s27 + $0x8] sm:$0xff] }
 0x245   : > { %v1397_v61 = vadd.f32 %v2026_v60, %v1079_v55  ;;  %v1082_v62 = vadd.f32 %v2597_v51, %v1081_v59  ;;  %v1352_v55 = vld [vmem:[%s2436_s27 + $0x98] sm:$0xff]  ;;  %v1350_v59 = vld [vmem:[%s2436_s27 + $0x88] sm:$0xff] }
 0x246   : > { %1463 = vst [vmem:[%s2607_s7 + $0x10] sm:$0xff] %v1399_v57  ;;  %v1400_v63 = vadd.f32 %v1090_v58, %v2452_v12 }
 0x247   : > { %1461 = vst [vmem:[%s2607_s7] sm:$0xff] %v1397_v61  ;;  %v1398_v0 = vadd.f32 %v2027_v11, %v1082_v62 }
 0x248   : > { %1464 = vst [vmem:[%s2607_s7 + $0x18] sm:$0xff] %v1400_v63 }
 0x249   : > { %1462 = vst [vmem:[%s2607_s7 + $0x8] sm:$0xff] %v1398_v0  ;;  %v1863_v1 = vpop.f32.mrb[4].mxu1  ;;  %v1355_v0 = vld [vmem:[%s2436_s27 + $0xb0] sm:$0xff] }
 0x24a   : > { %v1103_v2 = vadd.f32 %v1863_v1, %v2597_v51  ;;  %v1094_v3 = vpop.f32.mrb[5].mxu1 }
 0x24b   : > { %v1095_v4 = vadd.f32 %v2597_v51, %v1094_v3  ;;  %v1864_v5 = vpop.f32.mrb[6].mxu1  ;;  %v1353_v3 = vld [vmem:[%s2436_s27 + $0xa0] sm:$0xff] }
 0x24c   : > { %v1403_v6 = vadd.f32 %v1103_v2, %v2462_v19  ;;  %v1106_v12 = vadd.f32 %v1864_v5, %v2597_v51  ;;  %v1097_v7 = vpop.f32.mrb[7].mxu1 }
 0x24d   : > { %v1401_v9 = vadd.f32 %v1095_v4, %v2455_v13  ;;  %v1098_v10 = vadd.f32 %v2597_v51, %v1097_v7  ;;  %v1341_v13 = vld [vmem:[%s2436_s27 + $0x40] sm:$0xff] }
 0x24e   : > { %1467 = vst [vmem:[%s2607_s7 + $0x30] sm:$0xff] %v1403_v6  ;;  %v1404_v14 = vadd.f32 %v1106_v12, %v2465_v20  ;;  %v1344_v20 = vld [vmem:[%s2436_s27 + $0x58] sm:$0xff] }
 0x24f   : > { %1465 = vst [vmem:[%s2607_s7 + $0x20] sm:$0xff] %v1401_v9  ;;  %v1402_v15 = vadd.f32 %v1338_v8, %v1098_v10  ;;  %v1356_v6 = vld [vmem:[%s2436_s27 + $0xb8] sm:$0xff]  ;;  %v1354_v9 = vld [vmem:[%s2436_s27 + $0xa8] sm:$0xff] }
 0x250   : > { %1468 = vst [vmem:[%s2607_s7 + $0x38] sm:$0xff] %v1404_v14 }
 0x251   : > { %1466 = vst [vmem:[%s2607_s7 + $0x28] sm:$0xff] %v1402_v15  ;;  %v1867_v19 = vpop.f32.mrb[8].mxu1 }
 0x252   : > { %v1119_v17 = vadd.f32 %v1867_v19, %v2597_v51  ;;  %v1110_v18 = vpop.f32.mrb[9].mxu1 }
 0x253   : > { %v1111_v21 = vadd.f32 %v2597_v51, %v1110_v18  ;;  %v1868_v22 = vpop.f32.mrb[10].mxu1 }
 0x254   : > { %v1407_v23 = vadd.f32 %v1343_v16, %v1119_v17  ;;  %v1122_v24 = vadd.f32 %v1868_v22, %v2597_v51  ;;  %v1113_v25 = vpop.f32.mrb[11].mxu1  ;;  %v1359_v17 = vld [vmem:[%s2436_s27 + $0xd0] sm:$0xff] }
 0x255   : > { %v1405_v27 = vadd.f32 %v1341_v13, %v1111_v21  ;;  %v1114_v28 = vadd.f32 %v2597_v51, %v1113_v25  ;;  %v1357_v21 = vld [vmem:[%s2436_s27 + $0xc0] sm:$0xff] }
 0x256   : > { %1471 = vst [vmem:[%s2607_s7 + $0x50] sm:$0xff] %v1407_v23  ;;  %v1408_v29 = vadd.f32 %v1344_v20, %v1122_v24  ;;  %v1360_v23 = vld [vmem:[%s2436_s27 + $0xd8] sm:$0xff] }
 0x257   : > { %1469 = vst [vmem:[%s2607_s7 + $0x40] sm:$0xff] %v1405_v27  ;;  %v1406_v30 = vadd.f32 %v1342_v26, %v1114_v28  ;;  %v1358_v27 = vld [vmem:[%s2436_s27 + $0xc8] sm:$0xff] }
 0x258   : > { %1472 = vst [vmem:[%s2607_s7 + $0x58] sm:$0xff] %v1408_v29 }
 0x259   : > { %1470 = vst [vmem:[%s2607_s7 + $0x48] sm:$0xff] %v1406_v30  ;;  %v1871_v31 = vpop.f32.mrb[12].mxu1 }
 0x25a   : > { %v1135_v33 = vadd.f32 %v1871_v31, %v2597_v51  ;;  %v1126_v34 = vpop.f32.mrb[13].mxu1 }
 0x25b   : > { %v1127_v36 = vadd.f32 %v2597_v51, %v1126_v34  ;;  %v1872_v37 = vpop.f32.mrb[14].mxu1 }
 0x25c   : > { %v1411_v39 = vadd.f32 %v1347_v32, %v1135_v33  ;;  %v1138_v40 = vadd.f32 %v1872_v37, %v2597_v51  ;;  %v1129_v41 = vpop.f32.mrb[15].mxu1  ;;  %v1363_v33 = vld [vmem:[%s2436_s27 + $0xf0] sm:$0xff] }
 0x25d   : > { %v1409_v43 = vadd.f32 %v1345_v35, %v1127_v36  ;;  %v1130_v44 = vadd.f32 %v2597_v51, %v1129_v41  ;;  %v1361_v36 = vld [vmem:[%s2436_s27 + $0xe0] sm:$0xff] }
 0x25e   : > { %1475 = vst [vmem:[%s2607_s7 + $0x70] sm:$0xff] %v1411_v39  ;;  %v1412_v45 = vadd.f32 %v1348_v38, %v1138_v40  ;;  %v1364_v39 = vld [vmem:[%s2436_s27 + $0xf8] sm:$0xff] }
 0x25f   : > { %1473 = vst [vmem:[%s2607_s7 + $0x60] sm:$0xff] %v1409_v43  ;;  %v1410_v46 = vadd.f32 %v1346_v42, %v1130_v44  ;;  %v1362_v43 = vld [vmem:[%s2436_s27 + $0xe8] sm:$0xff] }
 0x260   : > { %1476 = vst [vmem:[%s2607_s7 + $0x78] sm:$0xff] %v1412_v45 }
 0x261   : > { %1474 = vst [vmem:[%s2607_s7 + $0x68] sm:$0xff] %v1410_v46  ;;  %v1875_v47 = vpop.f32.mrb[16].mxu1 }
 0x262   : > { %v1151_v49 = vadd.f32 %v1875_v47, %v2597_v51  ;;  %v1142_v50 = vpop.f32.mrb[17].mxu1 }
 0x263   : > { %v1143_v52 = vadd.f32 %v2597_v51, %v1142_v50  ;;  %v1876_v54 = vpop.f32.mrb[18].mxu1 }
 0x264   : > { %v1415_v56 = vadd.f32 %v1351_v48, %v1151_v49  ;;  %v1154_v57 = vadd.f32 %v1876_v54, %v2597_v51  ;;  %v1145_v58 = vpop.f32.mrb[19].mxu1  ;;  %v1367_v49 = vld [vmem:[%s2436_s27 + $0x110] sm:$0xff] }
 0x265   : > { %v1413_v60 = vadd.f32 %v1349_v53, %v1143_v52  ;;  %v1146_v61 = vadd.f32 %v2597_v51, %v1145_v58  ;;  %v1365_v52 = vld [vmem:[%s2436_s27 + $0x100] sm:$0xff] }
 0x266   : > { %1479 = vst [vmem:[%s2607_s7 + $0x90] sm:$0xff] %v1415_v56  ;;  %v1416_v62 = vadd.f32 %v1352_v55, %v1154_v57  ;;  %v1368_v56 = vld [vmem:[%s2436_s27 + $0x118] sm:$0xff] }
 0x267   : > { %1477 = vst [vmem:[%s2607_s7 + $0x80] sm:$0xff] %v1413_v60  ;;  %v1414_v63 = vadd.f32 %v1350_v59, %v1146_v61  ;;  %v1366_v60 = vld [vmem:[%s2436_s27 + $0x108] sm:$0xff] }
 0x268   : > { %1480 = vst [vmem:[%s2607_s7 + $0x98] sm:$0xff] %v1416_v62 }
 0x269   : > { %1478 = vst [vmem:[%s2607_s7 + $0x88] sm:$0xff] %v1414_v63  ;;  %v1879_v11 = vpop.f32.mrb[20].mxu1 }
 0x26a   : > { %v1167_v1 = vadd.f32 %v1879_v11, %v2597_v51  ;;  %v1158_v2 = vpop.f32.mrb[21].mxu1 }
 0x26b   : > { %v1159_v4 = vadd.f32 %v2597_v51, %v1158_v2  ;;  %v1880_v5 = vpop.f32.mrb[22].mxu1 }
 0x26c   : > { %v1419_v12 = vadd.f32 %v1355_v0, %v1167_v1  ;;  %v1170_v7 = vadd.f32 %v1880_v5, %v2597_v51  ;;  %v1161_v8 = vpop.f32.mrb[23].mxu1  ;;  %v1371_v1 = vld [vmem:[%s2436_s27 + $0x130] sm:$0xff] }
 0x26d   : > { %v1417_v10 = vadd.f32 %v1353_v3, %v1159_v4  ;;  %v1162_v14 = vadd.f32 %v2597_v51, %v1161_v8  ;;  %v1369_v4 = vld [vmem:[%s2436_s27 + $0x120] sm:$0xff] }
 0x26e   : > { %1483 = vst [vmem:[%s2607_s7 + $0xb0] sm:$0xff] %v1419_v12  ;;  %v1420_v15 = vadd.f32 %v1356_v6, %v1170_v7  ;;  %v1372_v12 = vld [vmem:[%s2436_s27 + $0x138] sm:$0xff] }
 0x26f   : > { %1481 = vst [vmem:[%s2607_s7 + $0xa0] sm:$0xff] %v1417_v10  ;;  %v1418_v19 = vadd.f32 %v1354_v9, %v1162_v14  ;;  %v1370_v10 = vld [vmem:[%s2436_s27 + $0x128] sm:$0xff] }
 0x270   : > { %1484 = vst [vmem:[%s2607_s7 + $0xb8] sm:$0xff] %v1420_v15 }
 0x271   : > { %1482 = vst [vmem:[%s2607_s7 + $0xa8] sm:$0xff] %v1418_v19  ;;  %v1883_v16 = vpop.f32.mrb[24].mxu1 }
 0x272   : > { %v1183_v18 = vadd.f32 %v1883_v16, %v2597_v51  ;;  %v1174_v13 = vpop.f32.mrb[25].mxu1 }
 0x273   : > { %v1175_v22 = vadd.f32 %v2597_v51, %v1174_v13  ;;  %v1884_v20 = vpop.f32.mrb[26].mxu1 }
 0x274   : > { %v1423_v24 = vadd.f32 %v1359_v17, %v1183_v18  ;;  %v1186_v25 = vadd.f32 %v1884_v20, %v2597_v51  ;;  %v1177_v26 = vpop.f32.mrb[27].mxu1  ;;  %v1375_v18 = vld [vmem:[%s2436_s27 + $0x150] sm:$0xff] }
 0x275   : > { %v1421_v28 = vadd.f32 %v1357_v21, %v1175_v22  ;;  %v1178_v29 = vadd.f32 %v2597_v51, %v1177_v26  ;;  %v1373_v22 = vld [vmem:[%s2436_s27 + $0x140] sm:$0xff] }
 0x276   : > { %1487 = vst [vmem:[%s2607_s7 + $0xd0] sm:$0xff] %v1423_v24  ;;  %v1424_v30 = vadd.f32 %v1360_v23, %v1186_v25  ;;  %v1376_v24 = vld [vmem:[%s2436_s27 + $0x158] sm:$0xff] }
 0x277   : > { %1485 = vst [vmem:[%s2607_s7 + $0xc0] sm:$0xff] %v1421_v28  ;;  %v1422_v31 = vadd.f32 %v1358_v27, %v1178_v29  ;;  %v1374_v28 = vld [vmem:[%s2436_s27 + $0x148] sm:$0xff] }
 0x278   : > { %1488 = vst [vmem:[%s2607_s7 + $0xd8] sm:$0xff] %v1424_v30 }
 0x279   : > { %1486 = vst [vmem:[%s2607_s7 + $0xc8] sm:$0xff] %v1422_v31  ;;  %v1887_v32 = vpop.f32.mrb[28].mxu1 }
 0x27a   : > { %v1199_v34 = vadd.f32 %v1887_v32, %v2597_v51  ;;  %v1190_v35 = vpop.f32.mrb[29].mxu1 }
 0x27b   : > { %v1191_v37 = vadd.f32 %v2597_v51, %v1190_v35  ;;  %v1888_v38 = vpop.f32.mrb[30].mxu1 }
 0x27c   : > { %v1427_v40 = vadd.f32 %v1363_v33, %v1199_v34  ;;  %v1202_v41 = vadd.f32 %v1888_v38, %v2597_v51  ;;  %v1193_v42 = vpop.f32.mrb[31].mxu1  ;;  %v1379_v34 = vld [vmem:[%s2436_s27 + $0x170] sm:$0xff] }
 0x27d   : > { %v1425_v44 = vadd.f32 %v1361_v36, %v1191_v37  ;;  %v1194_v45 = vadd.f32 %v2597_v51, %v1193_v42  ;;  %v1377_v37 = vld [vmem:[%s2436_s27 + $0x160] sm:$0xff] }
 0x27e   : > { %1491 = vst [vmem:[%s2607_s7 + $0xf0] sm:$0xff] %v1427_v40  ;;  %v1428_v46 = vadd.f32 %v1364_v39, %v1202_v41  ;;  %v1380_v40 = vld [vmem:[%s2436_s27 + $0x178] sm:$0xff] }
 0x27f   : > { %1489 = vst [vmem:[%s2607_s7 + $0xe0] sm:$0xff] %v1425_v44  ;;  %v1426_v47 = vadd.f32 %v1362_v43, %v1194_v45  ;;  %v1378_v44 = vld [vmem:[%s2436_s27 + $0x168] sm:$0xff] }
 0x280   : > { %1492 = vst [vmem:[%s2607_s7 + $0xf8] sm:$0xff] %v1428_v46 }
 0x281   : > { %1490 = vst [vmem:[%s2607_s7 + $0xe8] sm:$0xff] %v1426_v47  ;;  %v1891_v48 = vpop.f32.mrb[32].mxu1 }
 0x282   : > { %v1215_v50 = vadd.f32 %v1891_v48, %v2597_v51  ;;  %v1206_v53 = vpop.f32.mrb[33].mxu1 }
 0x283   : > { %v1207_v54 = vadd.f32 %v2597_v51, %v1206_v53  ;;  %v1892_v55 = vpop.f32.mrb[34].mxu1 }
 0x284   : > { %v1431_v57 = vadd.f32 %v1367_v49, %v1215_v50  ;;  %v1218_v58 = vadd.f32 %v1892_v55, %v2597_v51  ;;  %v1209_v59 = vpop.f32.mrb[35].mxu1  ;;  %v1383_v50 = vld [vmem:[%s2436_s27 + $0x190] sm:$0xff] }
 0x285   : > { %v1429_v61 = vadd.f32 %v1365_v52, %v1207_v54  ;;  %v1210_v62 = vadd.f32 %v2597_v51, %v1209_v59  ;;  %v1381_v54 = vld [vmem:[%s2436_s27 + $0x180] sm:$0xff] }
 0x286   : > { %1495 = vst [vmem:[%s2607_s7 + $0x110] sm:$0xff] %v1431_v57  ;;  %v1432_v63 = vadd.f32 %v1368_v56, %v1218_v58  ;;  %v1384_v57 = vld [vmem:[%s2436_s27 + $0x198] sm:$0xff] }
 0x287   : > { %1493 = vst [vmem:[%s2607_s7 + $0x100] sm:$0xff] %v1429_v61  ;;  %v1430_v11 = vadd.f32 %v1366_v60, %v1210_v62  ;;  %v1382_v61 = vld [vmem:[%s2436_s27 + $0x188] sm:$0xff] }
 0x288   : > { %1496 = vst [vmem:[%s2607_s7 + $0x118] sm:$0xff] %v1432_v63 }
 0x289   : > { %1494 = vst [vmem:[%s2607_s7 + $0x108] sm:$0xff] %v1430_v11  ;;  %v1895_v0 = vpop.f32.mrb[36].mxu1 }
 0x28a   : > { %v1231_v2 = vadd.f32 %v1895_v0, %v2597_v51  ;;  %v1222_v3 = vpop.f32.mrb[37].mxu1 }
 0x28b   : > { %v1223_v5 = vadd.f32 %v2597_v51, %v1222_v3  ;;  %v1896_v6 = vpop.f32.mrb[38].mxu1 }
 0x28c   : > { %v1435_v7 = vadd.f32 %v1371_v1, %v1231_v2  ;;  %v1234_v8 = vadd.f32 %v1896_v6, %v2597_v51  ;;  %v1225_v9 = vpop.f32.mrb[39].mxu1  ;;  %v1387_v2 = vld [vmem:[%s2436_s27 + $0x1b0] sm:$0xff] }
 0x28d   : > { %v1433_v14 = vadd.f32 %v1369_v4, %v1223_v5  ;;  %v1226_v15 = vadd.f32 %v2597_v51, %v1225_v9  ;;  %v1385_v5 = vld [vmem:[%s2436_s27 + $0x1a0] sm:$0xff] }
 0x28e   : > { %1499 = vst [vmem:[%s2607_s7 + $0x130] sm:$0xff] %v1435_v7  ;;  %v1436_v19 = vadd.f32 %v1372_v12, %v1234_v8  ;;  %v1388_v7 = vld [vmem:[%s2436_s27 + $0x1b8] sm:$0xff] }
 0x28f   : > { %1497 = vst [vmem:[%s2607_s7 + $0x120] sm:$0xff] %v1433_v14  ;;  %v1434_v16 = vadd.f32 %v1370_v10, %v1226_v15  ;;  %v1386_v14 = vld [vmem:[%s2436_s27 + $0x1a8] sm:$0xff] }
 0x290   : > { %1500 = vst [vmem:[%s2607_s7 + $0x138] sm:$0xff] %v1436_v19 }
 0x291   : > { %1498 = vst [vmem:[%s2607_s7 + $0x128] sm:$0xff] %v1434_v16  ;;  %v1899_v17 = vpop.f32.mrb[40].mxu1 }
 0x292   : > { %v1247_v13 = vadd.f32 %v1899_v17, %v2597_v51  ;;  %v1238_v21 = vpop.f32.mrb[41].mxu1 }
 0x293   : > { %v1239_v20 = vadd.f32 %v2597_v51, %v1238_v21  ;;  %v1900_v23 = vpop.f32.mrb[42].mxu1 }
 0x294   : > { %v1439_v25 = vadd.f32 %v1375_v18, %v1247_v13  ;;  %v1250_v26 = vadd.f32 %v1900_v23, %v2597_v51  ;;  %v1241_v27 = vpop.f32.mrb[43].mxu1  ;;  %v1391_v13 = vld [vmem:[%s2436_s27 + $0x1d0] sm:$0xff] }
 0x295   : > { %v1437_v29 = vadd.f32 %v1373_v22, %v1239_v20  ;;  %v1242_v30 = vadd.f32 %v2597_v51, %v1241_v27  ;;  %v1389_v20 = vld [vmem:[%s2436_s27 + $0x1c0] sm:$0xff] }
 0x296   : > { %1503 = vst [vmem:[%s2607_s7 + $0x150] sm:$0xff] %v1439_v25  ;;  %v1440_v31 = vadd.f32 %v1376_v24, %v1250_v26  ;;  %v1392_v25 = vld [vmem:[%s2436_s27 + $0x1d8] sm:$0xff] }
 0x297   : > { %1501 = vst [vmem:[%s2607_s7 + $0x140] sm:$0xff] %v1437_v29  ;;  %v1438_v32 = vadd.f32 %v1374_v28, %v1242_v30  ;;  %v1390_v29 = vld [vmem:[%s2436_s27 + $0x1c8] sm:$0xff] }
 0x298   : > { %1504 = vst [vmem:[%s2607_s7 + $0x158] sm:$0xff] %v1440_v31 }
 0x299   : > { %1502 = vst [vmem:[%s2607_s7 + $0x148] sm:$0xff] %v1438_v32  ;;  %v1903_v33 = vpop.f32.mrb[44].mxu1 }
 0x29a   : > { %v1263_v35 = vadd.f32 %v1903_v33, %v2597_v51  ;;  %v1254_v36 = vpop.f32.mrb[45].mxu1 }
 0x29b   : > { %v1255_v38 = vadd.f32 %v2597_v51, %v1254_v36  ;;  %v1904_v39 = vpop.f32.mrb[46].mxu1 }
 0x29c   : > { %v1443_v41 = vadd.f32 %v1379_v34, %v1263_v35  ;;  %v1266_v42 = vadd.f32 %v1904_v39, %v2597_v51  ;;  %v1257_v43 = vpop.f32.mrb[47].mxu1  ;;  %v1395_v35 = vld [vmem:[%s2436_s27 + $0x1f0] sm:$0xff] }
 0x29d   : > { %v1441_v45 = vadd.f32 %v1377_v37, %v1255_v38  ;;  %v1258_v46 = vadd.f32 %v2597_v51, %v1257_v43  ;;  %v1393_v38 = vld [vmem:[%s2436_s27 + $0x1e0] sm:$0xff] }
 0x29e   : > { %1507 = vst [vmem:[%s2607_s7 + $0x170] sm:$0xff] %v1443_v41  ;;  %v1444_v47 = vadd.f32 %v1380_v40, %v1266_v42  ;;  %v1396_v41 = vld [vmem:[%s2436_s27 + $0x1f8] sm:$0xff] }
 0x29f   : > { %1505 = vst [vmem:[%s2607_s7 + $0x160] sm:$0xff] %v1441_v45  ;;  %v1442_v48 = vadd.f32 %v1378_v44, %v1258_v46  ;;  %v1394_v45 = vld [vmem:[%s2436_s27 + $0x1e8] sm:$0xff]  ;;  %s2120_s27 = scalar_lea.vmem %s2119_s15, 16384 }
 0x2a0   : > { %1508 = vst [vmem:[%s2607_s7 + $0x178] sm:$0xff] %v1444_v47  ;;  %p2122_p5 = scmp.lt.s32.totalorder %s2120_s27, %s2114_s25 }
 0x2a1   : > { %1506 = vst [vmem:[%s2607_s7 + $0x168] sm:$0xff] %v1442_v48  ;;  %v1907_v49 = vpop.f32.mrb[48].mxu1 }
 0x2a2   : > { %v1279_v53 = vadd.f32 %v1907_v49, %v2597_v51  ;;  %v1270_v52 = vpop.f32.mrb[49].mxu1  ;;  %p2123_p9 = por %p2122_p5, %p2121_p3 }
 0x2a3   : > { %v1271_v55 = vadd.f32 %v2597_v51, %v1270_v52  ;;  %v1908_v56 = vpop.f32.mrb[50].mxu1 }
 0x2a4   : > { %v1447_v58 = vadd.f32 %v1383_v50, %v1279_v53  ;;  %v1282_v59 = vadd.f32 %v1908_v56, %v2597_v51  ;;  %v1273_v60 = vpop.f32.mrb[51].mxu1  ;;  %p2124_p11 = pnand %p2123_p9, %p2117_p10 }
 0x2a5   : > { %v1445_v62 = vadd.f32 %v1381_v54, %v1271_v55  ;;  %v1274_v63 = vadd.f32 %v2597_v51, %v1273_v60 }
 0x2a6   : > { %1511 = vst [vmem:[%s2607_s7 + $0x190] sm:$0xff] %v1447_v58  ;;  %v1448_v11 = vadd.f32 %v1384_v57, %v1282_v59 }
 0x2a7   : > { %1509 = vst [vmem:[%s2607_s7 + $0x180] sm:$0xff] %v1445_v62  ;;  %v1446_v0 = vadd.f32 %v1382_v61, %v1274_v63 }
 0x2a8   : > { %1512 = vst [vmem:[%s2607_s7 + $0x198] sm:$0xff] %v1448_v11 }
 0x2a9   : > { %1510 = vst [vmem:[%s2607_s7 + $0x188] sm:$0xff] %v1446_v0  ;;  %v1911_v1 = vpop.f32.mrb[52].mxu1 }
 0x2aa   : > { %v1295_v3 = vadd.f32 %v1911_v1, %v2597_v51  ;;  %v1286_v4 = vpop.f32.mrb[53].mxu1 }
 0x2ab   : > { %v1287_v6 = vadd.f32 %v2597_v51, %v1286_v4  ;;  %v1912_v12 = vpop.f32.mrb[54].mxu1 }
 0x2ac   : > { %v1451_v8 = vadd.f32 %v1387_v2, %v1295_v3  ;;  %v1298_v9 = vadd.f32 %v1912_v12, %v2597_v51  ;;  %v1289_v10 = vpop.f32.mrb[55].mxu1 }
 0x2ad   : > { %v1449_v15 = vadd.f32 %v1385_v5, %v1287_v6  ;;  %v1290_v19 = vadd.f32 %v2597_v51, %v1289_v10 }
 0x2ae   : > { %1515 = vst [vmem:[%s2607_s7 + $0x1b0] sm:$0xff] %v1451_v8  ;;  %v1452_v16 = vadd.f32 %v1388_v7, %v1298_v9 }
 0x2af   : > { %1513 = vst [vmem:[%s2607_s7 + $0x1a0] sm:$0xff] %v1449_v15  ;;  %v1450_v17 = vadd.f32 %v1386_v14, %v1290_v19 }
 0x2b0   : > { %1516 = vst [vmem:[%s2607_s7 + $0x1b8] sm:$0xff] %v1452_v16 }
 0x2b1   : > { %1514 = vst [vmem:[%s2607_s7 + $0x1a8] sm:$0xff] %v1450_v17  ;;  %v1915_v18 = vpop.f32.mrb[56].mxu1 }
 0x2b2   : > { %v1311_v21 = vadd.f32 %v1915_v18, %v2597_v51  ;;  %v1302_v22 = vpop.f32.mrb[57].mxu1 }
 0x2b3   : > { %v1303_v23 = vadd.f32 %v2597_v51, %v1302_v22  ;;  %v1916_v24 = vpop.f32.mrb[58].mxu1 }
 0x2b4   : > { %v1455_v26 = vadd.f32 %v1391_v13, %v1311_v21  ;;  %v1314_v27 = vadd.f32 %v1916_v24, %v2597_v51  ;;  %v1305_v28 = vpop.f32.mrb[59].mxu1 }
 0x2b5   : > { %v1453_v30 = vadd.f32 %v1389_v20, %v1303_v23  ;;  %v1306_v31 = vadd.f32 %v2597_v51, %v1305_v28 }
 0x2b6   : > { %1519 = vst [vmem:[%s2607_s7 + $0x1d0] sm:$0xff] %v1455_v26  ;;  %v1456_v32 = vadd.f32 %v1392_v25, %v1314_v27 }
 0x2b7   : > { %1517 = vst [vmem:[%s2607_s7 + $0x1c0] sm:$0xff] %v1453_v30  ;;  %v1454_v33 = vadd.f32 %v1390_v29, %v1306_v31 }
 0x2b8   : > { %1520 = vst [vmem:[%s2607_s7 + $0x1d8] sm:$0xff] %v1456_v32 }
 0x2b9   : > { %1518 = vst [vmem:[%s2607_s7 + $0x1c8] sm:$0xff] %v1454_v33  ;;  %v1919_v34 = vpop.f32.mrb[60].mxu1 }
 0x2ba   : > { %v1327_v36 = vadd.f32 %v1919_v34, %v2597_v51  ;;  %v1318_v37 = vpop.f32.mrb[61].mxu1 }
 0x2bb   : > { %v1319_v39 = vadd.f32 %v2597_v51, %v1318_v37  ;;  %v1920_v40 = vpop.f32.mrb[62].mxu1 }
 0x2bc   : > { %v1459_v42 = vadd.f32 %v1395_v35, %v1327_v36  ;;  %v1330_v43 = vadd.f32 %v1920_v40, %v2597_v51  ;;  %v1321_v44 = vpop.f32.mrb[63].mxu1 }
 0x2bd   : > { %v1457_v46 = vadd.f32 %v1393_v38, %v1319_v39  ;;  %v1322_v47 = vadd.f32 %v2597_v51, %v1321_v44 }
 0x2be   : > { %1523 = vst [vmem:[%s2607_s7 + $0x1f0] sm:$0xff] %v1459_v42  ;;  %v1460_v48 = vadd.f32 %v1396_v41, %v1330_v43 }
 0x2bf   : > { %1521 = vst [vmem:[%s2607_s7 + $0x1e0] sm:$0xff] %v1457_v46  ;;  %v1458_v49 = vadd.f32 %v1394_v45, %v1322_v47 }
 0x2c0   : > { %1524 = vst [vmem:[%s2607_s7 + $0x1f8] sm:$0xff] %v1460_v48 }
 0x2c1   : > { %1522 = vst [vmem:[%s2607_s7 + $0x1e8] sm:$0xff] %v1458_v49 }
 0x2c2   : > { %2127 = shalt.err (!%p2124_p11)
}
 0x2c3   : > { %s2128_s26 = scalar_lea.hbm %s2797_s13, 8192  ;;  %s2132_s24 = scalar_lea.hbm %s2856_s5, 16384 }
 0x2c4   : > { %p2129_p0 = scmp.ne.s32.totalorder %s2797_s13, %s2128_s26  ;;  %p2133_p6 = scmp.lt.u32.totalorder %s2797_s13, %s2856_s5 }
 0x2c5   : > { %p2134_p7 = scmp.lt.u32.totalorder %s2132_s24, %s2128_s26  ;;  %p2136_p8 = scmp.lt.u32.totalorder %s2128_s26, %s2797_s13 }
 0x2c6   : > { %p2130_p4 = pnand %p2129_p0, %p2871_p12 }
 0x2c7   : > { %p2135_p2 = por %p2134_p7, %p2133_p6 }
 0x2c8   : > { %p2131_p13 = pneg %p2130_p4 }
 0x2c9   : > { %p2137_p1 = por %p2136_p8, %p2135_p2 }
 0x2cb   : > { %p2138_p10 = pnand %p2137_p1, %p2131_p13 }
 0x2cd   : > { %2141 = shalt.err (!%p2138_p10)
}
 0x2ce   : > { %s2210_s14 = smov 128   ;;  %s2211_s10 = smov 8  }
 0x2cf   : > { %1931 = dma.vmem_to_hbm [thread:$0]  (%p2871_p12), %s2799_s11, 8192, %s2797_s13, %s1526_s21, %s2210_s14, %s2210_s14, %s2211_s10  }
 0x2d0 PF: > { %s1555_s25 = sand.u32 1, %s2180_s18   ;;  %p2872_p3 = scmp.ne.s32.totalorder %s2864_s29, 0 }
 0x2d1   : > { %p2873_p5 = scmp.ge.s32.totalorder %s2200_s23, 2  ;;  %s1556_s17 = scalar_lea.sflag [#allocation5], %s1555_s25 }
 0x2d3   : > { %p1945_p9 = pnand %p2873_p5, %p2872_p3 }
 0x2d5   : > { %2175 = dma.done.wait (!%p1945_p9), %s1556_s17, 8192  }
 0x2d6   : > { %2177 = vsyncadd (!%p1945_p9), %s1556_s17, 4294959104  ;;  %s22_s23 = sadd.s32 1, %s2200_s23   ;;  %s2874_s18 = smov %s2184_s19 }
 0x2d7   : > { %p19_p11 = scmp.ge.s32.totalorder %s22_s23, 4   ;;  %s2875_s19 = smov %s2188_s20 }
 0x2d8   : > { %s2876_s20 = smov %s2384_s6  ;;  %s2877_s21 = smov %s2196_s22 }
 0x2d9   : > { %s2878_s22 = smov %s2880_s12  ;;  %21 = sbr.rel (!%p19_p11) target bundleno = 7 (0x7), region = 97 }
 0x2e0   :  { %1561 = vsyncpa [#allocation4], 1 }
 0x2e1   :  { %1563 = vsyncpa [#allocation4 + $0x1], 1 }
 0x2e2   :  { %1564 = vsyncpa [#allocation7], 1 }
 0x2e3   :  { %1565 = vsyncpa [#allocation5], 1 }
 0x2e4   :  { %1567 = vsyncpa [#allocation5 + $0x1], 1 }

</bundles_post_ra>
